<compile_context>
chip_gen: v7x
topology: tpu7x:2x2x1
jax: 0.10.0
libtpu: 0.0.40
codegen_flags: <defaults>
</compile_context>

<pallas_src>
import functools
import math

import jax
import jax.numpy as jnp
from jax.experimental import pallas as pl
from jax.experimental.pallas import tpu as pltpu


_SQRT_2_OVER_PI = math.sqrt(2.0 / math.pi)
_LN_EPS = 1e-5  # torch.nn.LayerNorm default eps


def _gelu_tanh(x):
    # Matches the module's custom GELU: 0.5*x*(1+tanh(sqrt(2/pi)*(x+0.044715*x^3)))
    return 0.5 * x * (1.0 + jnp.tanh(_SQRT_2_OVER_PI * (x + 0.044715 * x * x * x)))


def _layer_norm(x, gamma, beta):
    mu = jnp.mean(x, axis=-1, keepdims=True)
    xc = x - mu
    var = jnp.mean(xc * xc, axis=-1, keepdims=True)
    inv = jax.lax.rsqrt(var + _LN_EPS)
    return xc * inv * gamma + beta


def _gap_transformer_kernel(x_ref, w1_ref, b1_ref, w2_ref, b2_ref, pos_ref,
                            ln1g_ref, ln1b_ref, wqkv_ref, wo_ref, bo_ref,
                            ln2g_ref, ln2b_ref, wf1_ref, bf1_ref, wf2_ref,
                            bf2_ref, o_ref, *, depth, heads, dim_head):
    """Full GAP_Transformer forward for one batch element (all layers fused).

    x_ref:   (1, T, Din)
    w1/b1:   (Din, H) / (1, H)        input MLP layer 1
    w2/b2:   (H, D)   / (1, D)        input MLP layer 2  (D = mlp_dim)
    pos:     (T, D)                   positional embedding
    ln*g/b:  (depth, 1, D)            LayerNorm affine params
    wqkv:    (depth, D, 3*inner)      qkv projection (no bias)
    wo/bo:   (depth, inner, D) / (depth, 1, D)
    wf1/bf1: (depth, D, Dff) / (depth, 1, Dff)
    wf2/bf2: (depth, Dff, D) / (depth, 1, D)
    o_ref:   (1, T, D)
    """
    inner = heads * dim_head
    scale = dim_head ** -0.5

    x = x_ref[0]                       # (T, Din)
    T = x.shape[0]
    D = wo_ref.shape[2]

    # ---- input MLP: Linear -> GELU(tanh) -> Dropout(0) -> Linear ----
    h = jnp.dot(x, w1_ref[...], preferred_element_type=jnp.float32) + b1_ref[...]
    h = _gelu_tanh(h)
    h = jnp.dot(h, w2_ref[...], preferred_element_type=jnp.float32) + b2_ref[...]

    # ---- positional embedding ----
    h = h + pos_ref[...]

    # ---- transformer layers (activations stay VMEM-resident) ----
    for l in range(depth):
        # Residual(PreNorm(Attention))
        y = _layer_norm(h, ln1g_ref[l], ln1b_ref[l])
        qkv = jnp.dot(y, wqkv_ref[l], preferred_element_type=jnp.float32)  # (T, 3*inner)
        wo_l = wo_ref[l]                                                   # (inner, D)
        ao = jnp.zeros((T, D), jnp.float32)
        for hh in range(heads):
            lo = hh * dim_head
            hi = lo + dim_head
            q = qkv[:, lo:hi]
            k = qkv[:, inner + lo: inner + hi]
            v = qkv[:, 2 * inner + lo: 2 * inner + hi]
            # q @ k^T via dot_general (contract last dims) -> (T, T)
            dots = jax.lax.dot_general(
                q, k, (((1,), (1,)), ((), ())),
                preferred_element_type=jnp.float32) * scale
            dots = dots - jnp.max(dots, axis=-1, keepdims=True)
            e = jnp.exp(dots)
            attn = e / jnp.sum(e, axis=-1, keepdims=True)
            out_h = jnp.dot(attn, v, preferred_element_type=jnp.float32)   # (T, dh)
            # Fold the output projection per head: concat(heads)@Wo == sum_h out_h@Wo_rows
            ao = ao + jnp.dot(out_h, wo_l[lo:hi, :],
                              preferred_element_type=jnp.float32)
        h = h + ao + bo_ref[l]

        # Residual(PreNorm(FeedForward))
        y = _layer_norm(h, ln2g_ref[l], ln2b_ref[l])
        f = jnp.dot(y, wf1_ref[l], preferred_element_type=jnp.float32) + bf1_ref[l]
        f = _gelu_tanh(f)
        f = jnp.dot(f, wf2_ref[l], preferred_element_type=jnp.float32) + bf2_ref[l]
        h = h + f

    o_ref[0] = h


def gap_transformer(x, p, *, depth, heads, dim_head):
    """x: (B, T, input_dim) -> (B, T, mlp_dim), matching the PyTorch forward."""
    B, T, Din = x.shape
    H = p['w1'].shape[1]
    D = p['w2'].shape[1]
    inner = heads * dim_head
    Dff = p['wf1'].shape[2]

    kern = functools.partial(_gap_transformer_kernel, depth=depth,
                             heads=heads, dim_head=dim_head)

    # Rough cost estimate (advisory only).
    flops_per_b = (2 * T * (Din * H + H * D)
                   + depth * (2 * T * D * 3 * inner
                              + heads * (2 * T * T * dim_head) * 2
                              + 2 * T * inner * D
                              + 2 * T * D * Dff + 2 * T * Dff * D))
    bytes_weights = sum(int(v.size) * 4 for v in p.values())
    cost = pl.CostEstimate(
        flops=int(B * flops_per_b),
        transcendentals=int(B * (T * H + depth * (T * Dff + heads * T * T))),
        bytes_accessed=int(B * T * (Din + D) * 4 + bytes_weights))

    return pl.pallas_call(
        kern,
        out_shape=jax.ShapeDtypeStruct((B, T, D), jnp.float32),
        grid=(B,),
        in_specs=[
            pl.BlockSpec((1, T, Din), lambda b: (b, 0, 0)),
            pl.BlockSpec((Din, H), lambda b: (0, 0)),
            pl.BlockSpec((1, H), lambda b: (0, 0)),
            pl.BlockSpec((H, D), lambda b: (0, 0)),
            pl.BlockSpec((1, D), lambda b: (0, 0)),
            pl.BlockSpec((T, D), lambda b: (0, 0)),
            pl.BlockSpec((depth, 1, D), lambda b: (0, 0, 0)),
            pl.BlockSpec((depth, 1, D), lambda b: (0, 0, 0)),
            pl.BlockSpec((depth, D, 3 * inner), lambda b: (0, 0, 0)),
            pl.BlockSpec((depth, inner, D), lambda b: (0, 0, 0)),
            pl.BlockSpec((depth, 1, D), lambda b: (0, 0, 0)),
            pl.BlockSpec((depth, 1, D), lambda b: (0, 0, 0)),
            pl.BlockSpec((depth, 1, D), lambda b: (0, 0, 0)),
            pl.BlockSpec((depth, D, Dff), lambda b: (0, 0, 0)),
            pl.BlockSpec((depth, 1, Dff), lambda b: (0, 0, 0)),
            pl.BlockSpec((depth, Dff, D), lambda b: (0, 0, 0)),
            pl.BlockSpec((depth, 1, D), lambda b: (0, 0, 0)),
        ],
        out_specs=pl.BlockSpec((1, T, D), lambda b: (b, 0, 0)),
        compiler_params=pltpu.CompilerParams(
            dimension_semantics=("parallel",)),
        cost_estimate=cost,
    )(x, p['w1'], p['b1'], p['w2'], p['b2'], p['pos'],
      p['ln1g'], p['ln1b'], p['wqkv'], p['wo'], p['bo'],
      p['ln2g'], p['ln2b'], p['wf1'], p['bf1'], p['wf2'], p['bf2'])


def init_params(key, input_dim, hidden_dim, mlp_dim, depth, heads, dim_head, t):
    """Deterministic init mimicking PyTorch defaults (Linear: U(±1/sqrt(fan_in)),
    LayerNorm: gamma=1/beta=0, pos_embedding ~ N(0,1))."""
    inner = heads * dim_head
    D = mlp_dim
    Dff = mlp_dim  # FeedForward hidden dim == mlp_dim in GAP_Transformer

    def uni(k, shape, fan_in):
        bound = 1.0 / math.sqrt(float(fan_in))
        return jax.random.uniform(k, shape, jnp.float32, -bound, bound)

    keys = jax.random.split(key, 12)
    it = iter(keys)
    p = {}
    p['w1'] = uni(next(it), (input_dim, hidden_dim), input_dim)
    p['b1'] = uni(next(it), (1, hidden_dim), input_dim)
    p['w2'] = uni(next(it), (hidden_dim, D), hidden_dim)
    p['b2'] = uni(next(it), (1, D), hidden_dim)
    p['pos'] = jax.random.normal(next(it), (t, D), jnp.float32)
    p['ln1g'] = jnp.ones((depth, 1, D), jnp.float32)
    p['ln1b'] = jnp.zeros((depth, 1, D), jnp.float32)
    p['wqkv'] = uni(next(it), (depth, D, 3 * inner), D)
    p['wo'] = uni(next(it), (depth, inner, D), inner)
    p['bo'] = uni(next(it), (depth, 1, D), inner)
    p['ln2g'] = jnp.ones((depth, 1, D), jnp.float32)
    p['ln2b'] = jnp.zeros((depth, 1, D), jnp.float32)
    p['wf1'] = uni(next(it), (depth, D, Dff), D)
    p['bf1'] = uni(next(it), (depth, 1, Dff), D)
    p['wf2'] = uni(next(it), (depth, Dff, D), Dff)
    p['bf2'] = uni(next(it), (depth, 1, D), Dff)
    return p


# ---------------- pure-JAX reference for verification ----------------
def _ref_forward(x, p, *, depth, heads, dim_head):
    inner = heads * dim_head
    scale = dim_head ** -0.5
    h = _gelu_tanh(jnp.einsum('bti,ih->bth', x, p['w1']) + p['b1'][0])
    h = jnp.einsum('bth,hd->btd', h, p['w2']) + p['b2'][0]
    h = h + p['pos'][None]
    B, T, D = h.shape
    for l in range(depth):
        y = _layer_norm(h, p['ln1g'][l], p['ln1b'][l])
        qkv = jnp.einsum('btd,de->bte', y, p['wqkv'][l])
        q, k, v = jnp.split(qkv, 3, axis=-1)
        q = q.reshape(B, T, heads, dim_head).transpose(0, 2, 1, 3)
        k = k.reshape(B, T, heads, dim_head).transpose(0, 2, 1, 3)
        v = v.reshape(B, T, heads, dim_head).transpose(0, 2, 1, 3)
        dots = jnp.einsum('bhid,bhjd->bhij', q, k) * scale
        attn = jax.nn.softmax(dots, axis=-1)
        o = jnp.einsum('bhij,bhjd->bhid', attn, v)
        o = o.transpose(0, 2, 1, 3).reshape(B, T, inner)
        h = h + jnp.einsum('bte,ed->btd', o, p['wo'][l]) + p['bo'][l, 0]
        y = _layer_norm(h, p['ln2g'][l], p['ln2b'][l])
        f = _gelu_tanh(jnp.einsum('btd,df->btf', y, p['wf1'][l]) + p['bf1'][l, 0])
        h = h + jnp.einsum('btf,fd->btd', f, p['wf2'][l]) + p['bf2'][l, 0]
    return h


if __name__ == "__main__":
    key = jax.random.PRNGKey(0)
    B, T = 2, 16
    input_dim, hidden_dim, mlp_dim = 8, 32, 32
    depth, heads, dim_head = 2, 4, 8

    kx, kp = jax.random.split(key)
    x = jax.random.normal(kx, (B, T, input_dim), jnp.float32)
    params = init_params(kp, input_dim, hidden_dim, mlp_dim, depth, heads,
                         dim_head, T)

    out = gap_transformer(x, params, depth=depth, heads=heads,
                          dim_head=dim_head)
    out = jax.block_until_ready(out)

    ref = _ref_forward(x, params, depth=depth, heads=heads, dim_head=dim_head)
    assert out.shape == (B, T, mlp_dim), out.shape
    max_err = float(jnp.max(jnp.abs(out - ref)))
    assert jnp.allclose(out, ref, atol=2e-3, rtol=2e-3), max_err
    print("KERNEL_OK")
</pallas_src>

<mosaic_0001>
module attributes {stable_mosaic.version = 11 : i64} {
  func.func @_gap_transformer_kernel(%arg0: i32, %arg1: memref<1x16x8xf32, #tpu.memory_space<vmem>>, %arg2: memref<8x32xf32, #tpu.memory_space<vmem>>, %arg3: memref<1x32xf32, #tpu.memory_space<vmem>>, %arg4: memref<32x32xf32, #tpu.memory_space<vmem>>, %arg5: memref<1x32xf32, #tpu.memory_space<vmem>>, %arg6: memref<16x32xf32, #tpu.memory_space<vmem>>, %arg7: memref<2x1x32xf32, #tpu.memory_space<vmem>>, %arg8: memref<2x1x32xf32, #tpu.memory_space<vmem>>, %arg9: memref<2x32x96xf32, #tpu.memory_space<vmem>>, %arg10: memref<2x32x32xf32, #tpu.memory_space<vmem>>, %arg11: memref<2x1x32xf32, #tpu.memory_space<vmem>>, %arg12: memref<2x1x32xf32, #tpu.memory_space<vmem>>, %arg13: memref<2x1x32xf32, #tpu.memory_space<vmem>>, %arg14: memref<2x32x32xf32, #tpu.memory_space<vmem>>, %arg15: memref<2x1x32xf32, #tpu.memory_space<vmem>>, %arg16: memref<2x32x32xf32, #tpu.memory_space<vmem>>, %arg17: memref<2x1x32xf32, #tpu.memory_space<vmem>>, %arg18: memref<1x16x32xf32, #tpu.memory_space<vmem>>) attributes {dimension_semantics = [#tpu.dimension_semantics<parallel>], iteration_bounds = array<i64: 2>, scalar_prefetch = 0 : i64, scratch_operands = 0 : i64, tpu.core_type = #tpu.core_type<tc>, window_params = [{transform_indices = @transform_0, window_bounds = array<i64: 1, 16, 8>}, {pipeline_mode = #tpu.pipeline_mode<synchronous>, transform_indices = @transform_1, window_bounds = array<i64: 8, 32>}, {pipeline_mode = #tpu.pipeline_mode<synchronous>, transform_indices = @transform_2, window_bounds = array<i64: 1, 32>}, {pipeline_mode = #tpu.pipeline_mode<synchronous>, transform_indices = @transform_3, window_bounds = array<i64: 32, 32>}, {pipeline_mode = #tpu.pipeline_mode<synchronous>, transform_indices = @transform_4, window_bounds = array<i64: 1, 32>}, {pipeline_mode = #tpu.pipeline_mode<synchronous>, transform_indices = @transform_5, window_bounds = array<i64: 16, 32>}, {pipeline_mode = #tpu.pipeline_mode<synchronous>, transform_indices = @transform_6, window_bounds = array<i64: 2, 1, 32>}, {pipeline_mode = #tpu.pipeline_mode<synchronous>, transform_indices = @transform_7, window_bounds = array<i64: 2, 1, 32>}, {pipeline_mode = #tpu.pipeline_mode<synchronous>, transform_indices = @transform_8, window_bounds = array<i64: 2, 32, 96>}, {pipeline_mode = #tpu.pipeline_mode<synchronous>, transform_indices = @transform_9, window_bounds = array<i64: 2, 32, 32>}, {pipeline_mode = #tpu.pipeline_mode<synchronous>, transform_indices = @transform_10, window_bounds = array<i64: 2, 1, 32>}, {pipeline_mode = #tpu.pipeline_mode<synchronous>, transform_indices = @transform_11, window_bounds = array<i64: 2, 1, 32>}, {pipeline_mode = #tpu.pipeline_mode<synchronous>, transform_indices = @transform_12, window_bounds = array<i64: 2, 1, 32>}, {pipeline_mode = #tpu.pipeline_mode<synchronous>, transform_indices = @transform_13, window_bounds = array<i64: 2, 32, 32>}, {pipeline_mode = #tpu.pipeline_mode<synchronous>, transform_indices = @transform_14, window_bounds = array<i64: 2, 1, 32>}, {pipeline_mode = #tpu.pipeline_mode<synchronous>, transform_indices = @transform_15, window_bounds = array<i64: 2, 32, 32>}, {pipeline_mode = #tpu.pipeline_mode<synchronous>, transform_indices = @transform_16, window_bounds = array<i64: 2, 1, 32>}, {transform_indices = @transform_17, window_bounds = array<i64: 1, 16, 32>}]} {
    %c0 = arith.constant 0 : index
    %c0_0 = arith.constant 0 : index
    %c0_1 = arith.constant 0 : index
    %0 = vector.load %arg1[%c0, %c0_0, %c0_1] : memref<1x16x8xf32, #tpu.memory_space<vmem>>, vector<1x16x8xf32>
    %1 = vector.shape_cast %0 : vector<1x16x8xf32> to vector<16x8xf32>
    %c0_2 = arith.constant 0 : index
    %c0_3 = arith.constant 0 : index
    %2 = vector.load %arg2[%c0_2, %c0_3] : memref<8x32xf32, #tpu.memory_space<vmem>>, vector<8x32xf32>
    %cst = arith.constant dense<0.000000e+00> : vector<16x32xf32>
    %3 = tpu.matmul %1, %2, %cst {dimension_numbers = #tpu.dot_dimension_numbers<[1], [0], [0], [1], [0, 0, 1, 1], [], []>} : vector<16x8xf32>, vector<8x32xf32>, vector<16x32xf32> -> vector<16x32xf32>
    %c0_4 = arith.constant 0 : index
    %c0_5 = arith.constant 0 : index
    %4 = vector.load %arg3[%c0_4, %c0_5] : memref<1x32xf32, #tpu.memory_space<vmem>>, vector<1x32xf32>
    %5 = vector.broadcast %4 : vector<1x32xf32> to vector<16x32xf32>
    %6 = arith.addf %3, %5 : vector<16x32xf32>
    %cst_6 = arith.constant 5.000000e-01 : f32
    %7 = vector.broadcast %cst_6 : f32 to vector<16x32xf32>
    %8 = arith.mulf %7, %6 : vector<16x32xf32>
    %cst_7 = arith.constant 4.471500e-02 : f32
    %9 = vector.broadcast %cst_7 : f32 to vector<16x32xf32>
    %10 = arith.mulf %9, %6 : vector<16x32xf32>
    %11 = arith.mulf %10, %6 : vector<16x32xf32>
    %12 = arith.mulf %11, %6 : vector<16x32xf32>
    %13 = arith.addf %6, %12 : vector<16x32xf32>
    %cst_8 = arith.constant 0.797884583 : f32
    %14 = vector.broadcast %cst_8 : f32 to vector<16x32xf32>
    %15 = arith.mulf %14, %13 : vector<16x32xf32>
    %16 = math.tanh %15 : vector<16x32xf32>
    %cst_9 = arith.constant 1.000000e+00 : f32
    %17 = vector.broadcast %cst_9 : f32 to vector<16x32xf32>
    %18 = arith.addf %17, %16 : vector<16x32xf32>
    %19 = arith.mulf %8, %18 : vector<16x32xf32>
    %c0_10 = arith.constant 0 : index
    %c0_11 = arith.constant 0 : index
    %20 = vector.load %arg4[%c0_10, %c0_11] : memref<32x32xf32, #tpu.memory_space<vmem>>, vector<32x32xf32>
    %cst_12 = arith.constant dense<0.000000e+00> : vector<16x32xf32>
    %21 = tpu.matmul %19, %20, %cst_12 {dimension_numbers = #tpu.dot_dimension_numbers<[1], [0], [0], [1], [0, 0, 1, 1], [], []>} : vector<16x32xf32>, vector<32x32xf32>, vector<16x32xf32> -> vector<16x32xf32>
    %c0_13 = arith.constant 0 : index
    %c0_14 = arith.constant 0 : index
    %22 = vector.load %arg5[%c0_13, %c0_14] : memref<1x32xf32, #tpu.memory_space<vmem>>, vector<1x32xf32>
    %23 = vector.broadcast %22 : vector<1x32xf32> to vector<16x32xf32>
    %24 = arith.addf %21, %23 : vector<16x32xf32>
    %c0_15 = arith.constant 0 : index
    %c0_16 = arith.constant 0 : index
    %25 = vector.load %arg6[%c0_15, %c0_16] : memref<16x32xf32, #tpu.memory_space<vmem>>, vector<16x32xf32>
    %26 = arith.addf %24, %25 : vector<16x32xf32>
    %c0_17 = arith.constant 0 : index
    %c0_18 = arith.constant 0 : index
    %c0_19 = arith.constant 0 : index
    %27 = vector.load %arg7[%c0_17, %c0_18, %c0_19] : memref<2x1x32xf32, #tpu.memory_space<vmem>>, vector<1x1x32xf32>
    %28 = vector.shape_cast %27 : vector<1x1x32xf32> to vector<1x32xf32>
    %c0_20 = arith.constant 0 : index
    %c0_21 = arith.constant 0 : index
    %c0_22 = arith.constant 0 : index
    %29 = vector.load %arg8[%c0_20, %c0_21, %c0_22] : memref<2x1x32xf32, #tpu.memory_space<vmem>>, vector<1x1x32xf32>
    %30 = vector.shape_cast %29 : vector<1x1x32xf32> to vector<1x32xf32>
    %cst_23 = arith.constant dense<0.000000e+00> : vector<16xf32>
    %31 = vector.multi_reduction <add>, %26, %cst_23 [1] : vector<16x32xf32> to vector<16xf32>
    %32 = vector.shape_cast %31 : vector<16xf32> to vector<16x1xf32>
    %cst_24 = arith.constant 3.200000e+01 : f32
    %33 = vector.broadcast %cst_24 : f32 to vector<16x1xf32>
    %34 = arith.divf %32, %33 : vector<16x1xf32>
    %35 = vector.broadcast %34 : vector<16x1xf32> to vector<16x32xf32>
    %36 = arith.subf %26, %35 : vector<16x32xf32>
    %37 = arith.mulf %36, %36 : vector<16x32xf32>
    %cst_25 = arith.constant dense<0.000000e+00> : vector<16xf32>
    %38 = vector.multi_reduction <add>, %37, %cst_25 [1] : vector<16x32xf32> to vector<16xf32>
    %39 = vector.shape_cast %38 : vector<16xf32> to vector<16x1xf32>
    %cst_26 = arith.constant 3.200000e+01 : f32
    %40 = vector.broadcast %cst_26 : f32 to vector<16x1xf32>
    %41 = arith.divf %39, %40 : vector<16x1xf32>
    %cst_27 = arith.constant 9.99999974E-6 : f32
    %42 = vector.broadcast %cst_27 : f32 to vector<16x1xf32>
    %43 = arith.addf %41, %42 : vector<16x1xf32>
    %44 = math.rsqrt %43 : vector<16x1xf32>
    %45 = vector.broadcast %44 : vector<16x1xf32> to vector<16x32xf32>
    %46 = arith.mulf %36, %45 : vector<16x32xf32>
    %47 = vector.broadcast %28 : vector<1x32xf32> to vector<16x32xf32>
    %48 = arith.mulf %46, %47 : vector<16x32xf32>
    %49 = vector.broadcast %30 : vector<1x32xf32> to vector<16x32xf32>
    %50 = arith.addf %48, %49 : vector<16x32xf32>
    %c0_28 = arith.constant 0 : index
    %c0_29 = arith.constant 0 : index
    %c0_30 = arith.constant 0 : index
    %51 = vector.load %arg9[%c0_28, %c0_29, %c0_30] : memref<2x32x96xf32, #tpu.memory_space<vmem>>, vector<1x32x96xf32>
    %52 = vector.shape_cast %51 : vector<1x32x96xf32> to vector<32x96xf32>
    %cst_31 = arith.constant dense<0.000000e+00> : vector<16x96xf32>
    %53 = tpu.matmul %50, %52, %cst_31 {dimension_numbers = #tpu.dot_dimension_numbers<[1], [0], [0], [1], [0, 0, 1, 1], [], []>} : vector<16x32xf32>, vector<32x96xf32>, vector<16x96xf32> -> vector<16x96xf32>
    %c0_32 = arith.constant 0 : index
    %c0_33 = arith.constant 0 : index
    %c0_34 = arith.constant 0 : index
    %54 = vector.load %arg10[%c0_32, %c0_33, %c0_34] : memref<2x32x32xf32, #tpu.memory_space<vmem>>, vector<1x32x32xf32>
    %55 = vector.shape_cast %54 : vector<1x32x32xf32> to vector<32x32xf32>
    %cst_35 = arith.constant 0.000000e+00 : f32
    %56 = vector.broadcast %cst_35 : f32 to vector<16x32xf32>
    %57 = vector.extract_strided_slice %53 {offsets = [0, 0], sizes = [16, 8], strides = [1, 1]} : vector<16x96xf32> to vector<16x8xf32>
    %58 = vector.extract_strided_slice %53 {offsets = [0, 32], sizes = [16, 8], strides = [1, 1]} : vector<16x96xf32> to vector<16x8xf32>
    %59 = vector.extract_strided_slice %53 {offsets = [0, 64], sizes = [16, 8], strides = [1, 1]} : vector<16x96xf32> to vector<16x8xf32>
    %cst_36 = arith.constant dense<0.000000e+00> : vector<16x16xf32>
    %60 = tpu.matmul %57, %58, %cst_36 {dimension_numbers = #tpu.dot_dimension_numbers<[1], [1], [0], [0], [0, 0, 1, 0], [], []>} : vector<16x8xf32>, vector<16x8xf32>, vector<16x16xf32> -> vector<16x16xf32>
    %cst_37 = arith.constant 0.353553385 : f32
    %61 = vector.broadcast %cst_37 : f32 to vector<16x16xf32>
    %62 = arith.mulf %60, %61 : vector<16x16xf32>
    %cst_38 = arith.constant dense<0xFF800000> : vector<16xf32>
    %63 = vector.multi_reduction <maximumf>, %62, %cst_38 [1] : vector<16x16xf32> to vector<16xf32>
    %64 = vector.shape_cast %63 : vector<16xf32> to vector<16x1xf32>
    %65 = vector.broadcast %64 : vector<16x1xf32> to vector<16x16xf32>
    %66 = arith.subf %62, %65 : vector<16x16xf32>
    %67 = math.exp %66 : vector<16x16xf32>
    %cst_39 = arith.constant dense<0.000000e+00> : vector<16xf32>
    %68 = vector.multi_reduction <add>, %67, %cst_39 [1] : vector<16x16xf32> to vector<16xf32>
    %69 = vector.shape_cast %68 : vector<16xf32> to vector<16x1xf32>
    %70 = vector.broadcast %69 : vector<16x1xf32> to vector<16x16xf32>
    %71 = arith.divf %67, %70 : vector<16x16xf32>
    %cst_40 = arith.constant dense<0.000000e+00> : vector<16x8xf32>
    %72 = tpu.matmul %71, %59, %cst_40 {dimension_numbers = #tpu.dot_dimension_numbers<[1], [0], [0], [1], [0, 0, 1, 1], [], []>} : vector<16x16xf32>, vector<16x8xf32>, vector<16x8xf32> -> vector<16x8xf32>
    %73 = vector.extract_strided_slice %55 {offsets = [0, 0], sizes = [8, 32], strides = [1, 1]} : vector<32x32xf32> to vector<8x32xf32>
    %cst_41 = arith.constant dense<0.000000e+00> : vector<16x32xf32>
    %74 = tpu.matmul %72, %73, %cst_41 {dimension_numbers = #tpu.dot_dimension_numbers<[1], [0], [0], [1], [0, 0, 1, 1], [], []>} : vector<16x8xf32>, vector<8x32xf32>, vector<16x32xf32> -> vector<16x32xf32>
    %75 = arith.addf %56, %74 : vector<16x32xf32>
    %76 = vector.extract_strided_slice %53 {offsets = [0, 8], sizes = [16, 8], strides = [1, 1]} : vector<16x96xf32> to vector<16x8xf32>
    %77 = vector.extract_strided_slice %53 {offsets = [0, 40], sizes = [16, 8], strides = [1, 1]} : vector<16x96xf32> to vector<16x8xf32>
    %78 = vector.extract_strided_slice %53 {offsets = [0, 72], sizes = [16, 8], strides = [1, 1]} : vector<16x96xf32> to vector<16x8xf32>
    %cst_42 = arith.constant dense<0.000000e+00> : vector<16x16xf32>
    %79 = tpu.matmul %76, %77, %cst_42 {dimension_numbers = #tpu.dot_dimension_numbers<[1], [1], [0], [0], [0, 0, 1, 0], [], []>} : vector<16x8xf32>, vector<16x8xf32>, vector<16x16xf32> -> vector<16x16xf32>
    %cst_43 = arith.constant 0.353553385 : f32
    %80 = vector.broadcast %cst_43 : f32 to vector<16x16xf32>
    %81 = arith.mulf %79, %80 : vector<16x16xf32>
    %cst_44 = arith.constant dense<0xFF800000> : vector<16xf32>
    %82 = vector.multi_reduction <maximumf>, %81, %cst_44 [1] : vector<16x16xf32> to vector<16xf32>
    %83 = vector.shape_cast %82 : vector<16xf32> to vector<16x1xf32>
    %84 = vector.broadcast %83 : vector<16x1xf32> to vector<16x16xf32>
    %85 = arith.subf %81, %84 : vector<16x16xf32>
    %86 = math.exp %85 : vector<16x16xf32>
    %cst_45 = arith.constant dense<0.000000e+00> : vector<16xf32>
    %87 = vector.multi_reduction <add>, %86, %cst_45 [1] : vector<16x16xf32> to vector<16xf32>
    %88 = vector.shape_cast %87 : vector<16xf32> to vector<16x1xf32>
    %89 = vector.broadcast %88 : vector<16x1xf32> to vector<16x16xf32>
    %90 = arith.divf %86, %89 : vector<16x16xf32>
    %cst_46 = arith.constant dense<0.000000e+00> : vector<16x8xf32>
    %91 = tpu.matmul %90, %78, %cst_46 {dimension_numbers = #tpu.dot_dimension_numbers<[1], [0], [0], [1], [0, 0, 1, 1], [], []>} : vector<16x16xf32>, vector<16x8xf32>, vector<16x8xf32> -> vector<16x8xf32>
    %92 = vector.extract_strided_slice %55 {offsets = [8, 0], sizes = [8, 32], strides = [1, 1]} : vector<32x32xf32> to vector<8x32xf32>
    %cst_47 = arith.constant dense<0.000000e+00> : vector<16x32xf32>
    %93 = tpu.matmul %91, %92, %cst_47 {dimension_numbers = #tpu.dot_dimension_numbers<[1], [0], [0], [1], [0, 0, 1, 1], [], []>} : vector<16x8xf32>, vector<8x32xf32>, vector<16x32xf32> -> vector<16x32xf32>
    %94 = arith.addf %75, %93 : vector<16x32xf32>
    %95 = vector.extract_strided_slice %53 {offsets = [0, 16], sizes = [16, 8], strides = [1, 1]} : vector<16x96xf32> to vector<16x8xf32>
    %96 = vector.extract_strided_slice %53 {offsets = [0, 48], sizes = [16, 8], strides = [1, 1]} : vector<16x96xf32> to vector<16x8xf32>
    %97 = vector.extract_strided_slice %53 {offsets = [0, 80], sizes = [16, 8], strides = [1, 1]} : vector<16x96xf32> to vector<16x8xf32>
    %cst_48 = arith.constant dense<0.000000e+00> : vector<16x16xf32>
    %98 = tpu.matmul %95, %96, %cst_48 {dimension_numbers = #tpu.dot_dimension_numbers<[1], [1], [0], [0], [0, 0, 1, 0], [], []>} : vector<16x8xf32>, vector<16x8xf32>, vector<16x16xf32> -> vector<16x16xf32>
    %cst_49 = arith.constant 0.353553385 : f32
    %99 = vector.broadcast %cst_49 : f32 to vector<16x16xf32>
    %100 = arith.mulf %98, %99 : vector<16x16xf32>
    %cst_50 = arith.constant dense<0xFF800000> : vector<16xf32>
    %101 = vector.multi_reduction <maximumf>, %100, %cst_50 [1] : vector<16x16xf32> to vector<16xf32>
    %102 = vector.shape_cast %101 : vector<16xf32> to vector<16x1xf32>
    %103 = vector.broadcast %102 : vector<16x1xf32> to vector<16x16xf32>
    %104 = arith.subf %100, %103 : vector<16x16xf32>
    %105 = math.exp %104 : vector<16x16xf32>
    %cst_51 = arith.constant dense<0.000000e+00> : vector<16xf32>
    %106 = vector.multi_reduction <add>, %105, %cst_51 [1] : vector<16x16xf32> to vector<16xf32>
    %107 = vector.shape_cast %106 : vector<16xf32> to vector<16x1xf32>
    %108 = vector.broadcast %107 : vector<16x1xf32> to vector<16x16xf32>
    %109 = arith.divf %105, %108 : vector<16x16xf32>
    %cst_52 = arith.constant dense<0.000000e+00> : vector<16x8xf32>
    %110 = tpu.matmul %109, %97, %cst_52 {dimension_numbers = #tpu.dot_dimension_numbers<[1], [0], [0], [1], [0, 0, 1, 1], [], []>} : vector<16x16xf32>, vector<16x8xf32>, vector<16x8xf32> -> vector<16x8xf32>
    %111 = vector.extract_strided_slice %55 {offsets = [16, 0], sizes = [8, 32], strides = [1, 1]} : vector<32x32xf32> to vector<8x32xf32>
    %cst_53 = arith.constant dense<0.000000e+00> : vector<16x32xf32>
    %112 = tpu.matmul %110, %111, %cst_53 {dimension_numbers = #tpu.dot_dimension_numbers<[1], [0], [0], [1], [0, 0, 1, 1], [], []>} : vector<16x8xf32>, vector<8x32xf32>, vector<16x32xf32> -> vector<16x32xf32>
    %113 = arith.addf %94, %112 : vector<16x32xf32>
    %114 = vector.extract_strided_slice %53 {offsets = [0, 24], sizes = [16, 8], strides = [1, 1]} : vector<16x96xf32> to vector<16x8xf32>
    %115 = vector.extract_strided_slice %53 {offsets = [0, 56], sizes = [16, 8], strides = [1, 1]} : vector<16x96xf32> to vector<16x8xf32>
    %116 = vector.extract_strided_slice %53 {offsets = [0, 88], sizes = [16, 8], strides = [1, 1]} : vector<16x96xf32> to vector<16x8xf32>
    %cst_54 = arith.constant dense<0.000000e+00> : vector<16x16xf32>
    %117 = tpu.matmul %114, %115, %cst_54 {dimension_numbers = #tpu.dot_dimension_numbers<[1], [1], [0], [0], [0, 0, 1, 0], [], []>} : vector<16x8xf32>, vector<16x8xf32>, vector<16x16xf32> -> vector<16x16xf32>
    %cst_55 = arith.constant 0.353553385 : f32
    %118 = vector.broadcast %cst_55 : f32 to vector<16x16xf32>
    %119 = arith.mulf %117, %118 : vector<16x16xf32>
    %cst_56 = arith.constant dense<0xFF800000> : vector<16xf32>
    %120 = vector.multi_reduction <maximumf>, %119, %cst_56 [1] : vector<16x16xf32> to vector<16xf32>
    %121 = vector.shape_cast %120 : vector<16xf32> to vector<16x1xf32>
    %122 = vector.broadcast %121 : vector<16x1xf32> to vector<16x16xf32>
    %123 = arith.subf %119, %122 : vector<16x16xf32>
    %124 = math.exp %123 : vector<16x16xf32>
    %cst_57 = arith.constant dense<0.000000e+00> : vector<16xf32>
    %125 = vector.multi_reduction <add>, %124, %cst_57 [1] : vector<16x16xf32> to vector<16xf32>
    %126 = vector.shape_cast %125 : vector<16xf32> to vector<16x1xf32>
    %127 = vector.broadcast %126 : vector<16x1xf32> to vector<16x16xf32>
    %128 = arith.divf %124, %127 : vector<16x16xf32>
    %cst_58 = arith.constant dense<0.000000e+00> : vector<16x8xf32>
    %129 = tpu.matmul %128, %116, %cst_58 {dimension_numbers = #tpu.dot_dimension_numbers<[1], [0], [0], [1], [0, 0, 1, 1], [], []>} : vector<16x16xf32>, vector<16x8xf32>, vector<16x8xf32> -> vector<16x8xf32>
    %130 = vector.extract_strided_slice %55 {offsets = [24, 0], sizes = [8, 32], strides = [1, 1]} : vector<32x32xf32> to vector<8x32xf32>
    %cst_59 = arith.constant dense<0.000000e+00> : vector<16x32xf32>
    %131 = tpu.matmul %129, %130, %cst_59 {dimension_numbers = #tpu.dot_dimension_numbers<[1], [0], [0], [1], [0, 0, 1, 1], [], []>} : vector<16x8xf32>, vector<8x32xf32>, vector<16x32xf32> -> vector<16x32xf32>
    %132 = arith.addf %113, %131 : vector<16x32xf32>
    %133 = arith.addf %26, %132 : vector<16x32xf32>
    %c0_60 = arith.constant 0 : index
    %c0_61 = arith.constant 0 : index
    %c0_62 = arith.constant 0 : index
    %134 = vector.load %arg11[%c0_60, %c0_61, %c0_62] : memref<2x1x32xf32, #tpu.memory_space<vmem>>, vector<1x1x32xf32>
    %135 = vector.shape_cast %134 : vector<1x1x32xf32> to vector<1x32xf32>
    %136 = vector.broadcast %135 : vector<1x32xf32> to vector<16x32xf32>
    %137 = arith.addf %133, %136 : vector<16x32xf32>
    %c0_63 = arith.constant 0 : index
    %c0_64 = arith.constant 0 : index
    %c0_65 = arith.constant 0 : index
    %138 = vector.load %arg12[%c0_63, %c0_64, %c0_65] : memref<2x1x32xf32, #tpu.memory_space<vmem>>, vector<1x1x32xf32>
    %139 = vector.shape_cast %138 : vector<1x1x32xf32> to vector<1x32xf32>
    %c0_66 = arith.constant 0 : index
    %c0_67 = arith.constant 0 : index
    %c0_68 = arith.constant 0 : index
    %140 = vector.load %arg13[%c0_66, %c0_67, %c0_68] : memref<2x1x32xf32, #tpu.memory_space<vmem>>, vector<1x1x32xf32>
    %141 = vector.shape_cast %140 : vector<1x1x32xf32> to vector<1x32xf32>
    %cst_69 = arith.constant dense<0.000000e+00> : vector<16xf32>
    %142 = vector.multi_reduction <add>, %137, %cst_69 [1] : vector<16x32xf32> to vector<16xf32>
    %143 = vector.shape_cast %142 : vector<16xf32> to vector<16x1xf32>
    %cst_70 = arith.constant 3.200000e+01 : f32
    %144 = vector.broadcast %cst_70 : f32 to vector<16x1xf32>
    %145 = arith.divf %143, %144 : vector<16x1xf32>
    %146 = vector.broadcast %145 : vector<16x1xf32> to vector<16x32xf32>
    %147 = arith.subf %137, %146 : vector<16x32xf32>
    %148 = arith.mulf %147, %147 : vector<16x32xf32>
    %cst_71 = arith.constant dense<0.000000e+00> : vector<16xf32>
    %149 = vector.multi_reduction <add>, %148, %cst_71 [1] : vector<16x32xf32> to vector<16xf32>
    %150 = vector.shape_cast %149 : vector<16xf32> to vector<16x1xf32>
    %cst_72 = arith.constant 3.200000e+01 : f32
    %151 = vector.broadcast %cst_72 : f32 to vector<16x1xf32>
    %152 = arith.divf %150, %151 : vector<16x1xf32>
    %cst_73 = arith.constant 9.99999974E-6 : f32
    %153 = vector.broadcast %cst_73 : f32 to vector<16x1xf32>
    %154 = arith.addf %152, %153 : vector<16x1xf32>
    %155 = math.rsqrt %154 : vector<16x1xf32>
    %156 = vector.broadcast %155 : vector<16x1xf32> to vector<16x32xf32>
    %157 = arith.mulf %147, %156 : vector<16x32xf32>
    %158 = vector.broadcast %139 : vector<1x32xf32> to vector<16x32xf32>
    %159 = arith.mulf %157, %158 : vector<16x32xf32>
    %160 = vector.broadcast %141 : vector<1x32xf32> to vector<16x32xf32>
    %161 = arith.addf %159, %160 : vector<16x32xf32>
    %c0_74 = arith.constant 0 : index
    %c0_75 = arith.constant 0 : index
    %c0_76 = arith.constant 0 : index
    %162 = vector.load %arg14[%c0_74, %c0_75, %c0_76] : memref<2x32x32xf32, #tpu.memory_space<vmem>>, vector<1x32x32xf32>
    %163 = vector.shape_cast %162 : vector<1x32x32xf32> to vector<32x32xf32>
    %cst_77 = arith.constant dense<0.000000e+00> : vector<16x32xf32>
    %164 = tpu.matmul %161, %163, %cst_77 {dimension_numbers = #tpu.dot_dimension_numbers<[1], [0], [0], [1], [0, 0, 1, 1], [], []>} : vector<16x32xf32>, vector<32x32xf32>, vector<16x32xf32> -> vector<16x32xf32>
    %c0_78 = arith.constant 0 : index
    %c0_79 = arith.constant 0 : index
    %c0_80 = arith.constant 0 : index
    %165 = vector.load %arg15[%c0_78, %c0_79, %c0_80] : memref<2x1x32xf32, #tpu.memory_space<vmem>>, vector<1x1x32xf32>
    %166 = vector.shape_cast %165 : vector<1x1x32xf32> to vector<1x32xf32>
    %167 = vector.broadcast %166 : vector<1x32xf32> to vector<16x32xf32>
    %168 = arith.addf %164, %167 : vector<16x32xf32>
    %cst_81 = arith.constant 5.000000e-01 : f32
    %169 = vector.broadcast %cst_81 : f32 to vector<16x32xf32>
    %170 = arith.mulf %169, %168 : vector<16x32xf32>
    %cst_82 = arith.constant 4.471500e-02 : f32
    %171 = vector.broadcast %cst_82 : f32 to vector<16x32xf32>
    %172 = arith.mulf %171, %168 : vector<16x32xf32>
    %173 = arith.mulf %172, %168 : vector<16x32xf32>
    %174 = arith.mulf %173, %168 : vector<16x32xf32>
    %175 = arith.addf %168, %174 : vector<16x32xf32>
    %cst_83 = arith.constant 0.797884583 : f32
    %176 = vector.broadcast %cst_83 : f32 to vector<16x32xf32>
    %177 = arith.mulf %176, %175 : vector<16x32xf32>
    %178 = math.tanh %177 : vector<16x32xf32>
    %cst_84 = arith.constant 1.000000e+00 : f32
    %179 = vector.broadcast %cst_84 : f32 to vector<16x32xf32>
    %180 = arith.addf %179, %178 : vector<16x32xf32>
    %181 = arith.mulf %170, %180 : vector<16x32xf32>
    %c0_85 = arith.constant 0 : index
    %c0_86 = arith.constant 0 : index
    %c0_87 = arith.constant 0 : index
    %182 = vector.load %arg16[%c0_85, %c0_86, %c0_87] : memref<2x32x32xf32, #tpu.memory_space<vmem>>, vector<1x32x32xf32>
    %183 = vector.shape_cast %182 : vector<1x32x32xf32> to vector<32x32xf32>
    %cst_88 = arith.constant dense<0.000000e+00> : vector<16x32xf32>
    %184 = tpu.matmul %181, %183, %cst_88 {dimension_numbers = #tpu.dot_dimension_numbers<[1], [0], [0], [1], [0, 0, 1, 1], [], []>} : vector<16x32xf32>, vector<32x32xf32>, vector<16x32xf32> -> vector<16x32xf32>
    %c0_89 = arith.constant 0 : index
    %c0_90 = arith.constant 0 : index
    %c0_91 = arith.constant 0 : index
    %185 = vector.load %arg17[%c0_89, %c0_90, %c0_91] : memref<2x1x32xf32, #tpu.memory_space<vmem>>, vector<1x1x32xf32>
    %186 = vector.shape_cast %185 : vector<1x1x32xf32> to vector<1x32xf32>
    %187 = vector.broadcast %186 : vector<1x32xf32> to vector<16x32xf32>
    %188 = arith.addf %184, %187 : vector<16x32xf32>
    %189 = arith.addf %137, %188 : vector<16x32xf32>
    %c1 = arith.constant 1 : index
    %c0_92 = arith.constant 0 : index
    %c0_93 = arith.constant 0 : index
    %190 = vector.load %arg7[%c1, %c0_92, %c0_93] : memref<2x1x32xf32, #tpu.memory_space<vmem>>, vector<1x1x32xf32>
    %191 = vector.shape_cast %190 : vector<1x1x32xf32> to vector<1x32xf32>
    %c1_94 = arith.constant 1 : index
    %c0_95 = arith.constant 0 : index
    %c0_96 = arith.constant 0 : index
    %192 = vector.load %arg8[%c1_94, %c0_95, %c0_96] : memref<2x1x32xf32, #tpu.memory_space<vmem>>, vector<1x1x32xf32>
    %193 = vector.shape_cast %192 : vector<1x1x32xf32> to vector<1x32xf32>
    %cst_97 = arith.constant dense<0.000000e+00> : vector<16xf32>
    %194 = vector.multi_reduction <add>, %189, %cst_97 [1] : vector<16x32xf32> to vector<16xf32>
    %195 = vector.shape_cast %194 : vector<16xf32> to vector<16x1xf32>
    %cst_98 = arith.constant 3.200000e+01 : f32
    %196 = vector.broadcast %cst_98 : f32 to vector<16x1xf32>
    %197 = arith.divf %195, %196 : vector<16x1xf32>
    %198 = vector.broadcast %197 : vector<16x1xf32> to vector<16x32xf32>
    %199 = arith.subf %189, %198 : vector<16x32xf32>
    %200 = arith.mulf %199, %199 : vector<16x32xf32>
    %cst_99 = arith.constant dense<0.000000e+00> : vector<16xf32>
    %201 = vector.multi_reduction <add>, %200, %cst_99 [1] : vector<16x32xf32> to vector<16xf32>
    %202 = vector.shape_cast %201 : vector<16xf32> to vector<16x1xf32>
    %cst_100 = arith.constant 3.200000e+01 : f32
    %203 = vector.broadcast %cst_100 : f32 to vector<16x1xf32>
    %204 = arith.divf %202, %203 : vector<16x1xf32>
    %cst_101 = arith.constant 9.99999974E-6 : f32
    %205 = vector.broadcast %cst_101 : f32 to vector<16x1xf32>
    %206 = arith.addf %204, %205 : vector<16x1xf32>
    %207 = math.rsqrt %206 : vector<16x1xf32>
    %208 = vector.broadcast %207 : vector<16x1xf32> to vector<16x32xf32>
    %209 = arith.mulf %199, %208 : vector<16x32xf32>
    %210 = vector.broadcast %191 : vector<1x32xf32> to vector<16x32xf32>
    %211 = arith.mulf %209, %210 : vector<16x32xf32>
    %212 = vector.broadcast %193 : vector<1x32xf32> to vector<16x32xf32>
    %213 = arith.addf %211, %212 : vector<16x32xf32>
    %c1_102 = arith.constant 1 : index
    %c0_103 = arith.constant 0 : index
    %c0_104 = arith.constant 0 : index
    %214 = vector.load %arg9[%c1_102, %c0_103, %c0_104] : memref<2x32x96xf32, #tpu.memory_space<vmem>>, vector<1x32x96xf32>
    %215 = vector.shape_cast %214 : vector<1x32x96xf32> to vector<32x96xf32>
    %cst_105 = arith.constant dense<0.000000e+00> : vector<16x96xf32>
    %216 = tpu.matmul %213, %215, %cst_105 {dimension_numbers = #tpu.dot_dimension_numbers<[1], [0], [0], [1], [0, 0, 1, 1], [], []>} : vector<16x32xf32>, vector<32x96xf32>, vector<16x96xf32> -> vector<16x96xf32>
    %c1_106 = arith.constant 1 : index
    %c0_107 = arith.constant 0 : index
    %c0_108 = arith.constant 0 : index
    %217 = vector.load %arg10[%c1_106, %c0_107, %c0_108] : memref<2x32x32xf32, #tpu.memory_space<vmem>>, vector<1x32x32xf32>
    %218 = vector.shape_cast %217 : vector<1x32x32xf32> to vector<32x32xf32>
    %cst_109 = arith.constant 0.000000e+00 : f32
    %219 = vector.broadcast %cst_109 : f32 to vector<16x32xf32>
    %220 = vector.extract_strided_slice %216 {offsets = [0, 0], sizes = [16, 8], strides = [1, 1]} : vector<16x96xf32> to vector<16x8xf32>
    %221 = vector.extract_strided_slice %216 {offsets = [0, 32], sizes = [16, 8], strides = [1, 1]} : vector<16x96xf32> to vector<16x8xf32>
    %222 = vector.extract_strided_slice %216 {offsets = [0, 64], sizes = [16, 8], strides = [1, 1]} : vector<16x96xf32> to vector<16x8xf32>
    %cst_110 = arith.constant dense<0.000000e+00> : vector<16x16xf32>
    %223 = tpu.matmul %220, %221, %cst_110 {dimension_numbers = #tpu.dot_dimension_numbers<[1], [1], [0], [0], [0, 0, 1, 0], [], []>} : vector<16x8xf32>, vector<16x8xf32>, vector<16x16xf32> -> vector<16x16xf32>
    %cst_111 = arith.constant 0.353553385 : f32
    %224 = vector.broadcast %cst_111 : f32 to vector<16x16xf32>
    %225 = arith.mulf %223, %224 : vector<16x16xf32>
    %cst_112 = arith.constant dense<0xFF800000> : vector<16xf32>
    %226 = vector.multi_reduction <maximumf>, %225, %cst_112 [1] : vector<16x16xf32> to vector<16xf32>
    %227 = vector.shape_cast %226 : vector<16xf32> to vector<16x1xf32>
    %228 = vector.broadcast %227 : vector<16x1xf32> to vector<16x16xf32>
    %229 = arith.subf %225, %228 : vector<16x16xf32>
    %230 = math.exp %229 : vector<16x16xf32>
    %cst_113 = arith.constant dense<0.000000e+00> : vector<16xf32>
    %231 = vector.multi_reduction <add>, %230, %cst_113 [1] : vector<16x16xf32> to vector<16xf32>
    %232 = vector.shape_cast %231 : vector<16xf32> to vector<16x1xf32>
    %233 = vector.broadcast %232 : vector<16x1xf32> to vector<16x16xf32>
    %234 = arith.divf %230, %233 : vector<16x16xf32>
    %cst_114 = arith.constant dense<0.000000e+00> : vector<16x8xf32>
    %235 = tpu.matmul %234, %222, %cst_114 {dimension_numbers = #tpu.dot_dimension_numbers<[1], [0], [0], [1], [0, 0, 1, 1], [], []>} : vector<16x16xf32>, vector<16x8xf32>, vector<16x8xf32> -> vector<16x8xf32>
    %236 = vector.extract_strided_slice %218 {offsets = [0, 0], sizes = [8, 32], strides = [1, 1]} : vector<32x32xf32> to vector<8x32xf32>
    %cst_115 = arith.constant dense<0.000000e+00> : vector<16x32xf32>
    %237 = tpu.matmul %235, %236, %cst_115 {dimension_numbers = #tpu.dot_dimension_numbers<[1], [0], [0], [1], [0, 0, 1, 1], [], []>} : vector<16x8xf32>, vector<8x32xf32>, vector<16x32xf32> -> vector<16x32xf32>
    %238 = arith.addf %219, %237 : vector<16x32xf32>
    %239 = vector.extract_strided_slice %216 {offsets = [0, 8], sizes = [16, 8], strides = [1, 1]} : vector<16x96xf32> to vector<16x8xf32>
    %240 = vector.extract_strided_slice %216 {offsets = [0, 40], sizes = [16, 8], strides = [1, 1]} : vector<16x96xf32> to vector<16x8xf32>
    %241 = vector.extract_strided_slice %216 {offsets = [0, 72], sizes = [16, 8], strides = [1, 1]} : vector<16x96xf32> to vector<16x8xf32>
    %cst_116 = arith.constant dense<0.000000e+00> : vector<16x16xf32>
    %242 = tpu.matmul %239, %240, %cst_116 {dimension_numbers = #tpu.dot_dimension_numbers<[1], [1], [0], [0], [0, 0, 1, 0], [], []>} : vector<16x8xf32>, vector<16x8xf32>, vector<16x16xf32> -> vector<16x16xf32>
    %cst_117 = arith.constant 0.353553385 : f32
    %243 = vector.broadcast %cst_117 : f32 to vector<16x16xf32>
    %244 = arith.mulf %242, %243 : vector<16x16xf32>
    %cst_118 = arith.constant dense<0xFF800000> : vector<16xf32>
    %245 = vector.multi_reduction <maximumf>, %244, %cst_118 [1] : vector<16x16xf32> to vector<16xf32>
    %246 = vector.shape_cast %245 : vector<16xf32> to vector<16x1xf32>
    %247 = vector.broadcast %246 : vector<16x1xf32> to vector<16x16xf32>
    %248 = arith.subf %244, %247 : vector<16x16xf32>
    %249 = math.exp %248 : vector<16x16xf32>
    %cst_119 = arith.constant dense<0.000000e+00> : vector<16xf32>
    %250 = vector.multi_reduction <add>, %249, %cst_119 [1] : vector<16x16xf32> to vector<16xf32>
    %251 = vector.shape_cast %250 : vector<16xf32> to vector<16x1xf32>
    %252 = vector.broadcast %251 : vector<16x1xf32> to vector<16x16xf32>
    %253 = arith.divf %249, %252 : vector<16x16xf32>
    %cst_120 = arith.constant dense<0.000000e+00> : vector<16x8xf32>
    %254 = tpu.matmul %253, %241, %cst_120 {dimension_numbers = #tpu.dot_dimension_numbers<[1], [0], [0], [1], [0, 0, 1, 1], [], []>} : vector<16x16xf32>, vector<16x8xf32>, vector<16x8xf32> -> vector<16x8xf32>
    %255 = vector.extract_strided_slice %218 {offsets = [8, 0], sizes = [8, 32], strides = [1, 1]} : vector<32x32xf32> to vector<8x32xf32>
    %cst_121 = arith.constant dense<0.000000e+00> : vector<16x32xf32>
    %256 = tpu.matmul %254, %255, %cst_121 {dimension_numbers = #tpu.dot_dimension_numbers<[1], [0], [0], [1], [0, 0, 1, 1], [], []>} : vector<16x8xf32>, vector<8x32xf32>, vector<16x32xf32> -> vector<16x32xf32>
    %257 = arith.addf %238, %256 : vector<16x32xf32>
    %258 = vector.extract_strided_slice %216 {offsets = [0, 16], sizes = [16, 8], strides = [1, 1]} : vector<16x96xf32> to vector<16x8xf32>
    %259 = vector.extract_strided_slice %216 {offsets = [0, 48], sizes = [16, 8], strides = [1, 1]} : vector<16x96xf32> to vector<16x8xf32>
    %260 = vector.extract_strided_slice %216 {offsets = [0, 80], sizes = [16, 8], strides = [1, 1]} : vector<16x96xf32> to vector<16x8xf32>
    %cst_122 = arith.constant dense<0.000000e+00> : vector<16x16xf32>
    %261 = tpu.matmul %258, %259, %cst_122 {dimension_numbers = #tpu.dot_dimension_numbers<[1], [1], [0], [0], [0, 0, 1, 0], [], []>} : vector<16x8xf32>, vector<16x8xf32>, vector<16x16xf32> -> vector<16x16xf32>
    %cst_123 = arith.constant 0.353553385 : f32
    %262 = vector.broadcast %cst_123 : f32 to vector<16x16xf32>
    %263 = arith.mulf %261, %262 : vector<16x16xf32>
    %cst_124 = arith.constant dense<0xFF800000> : vector<16xf32>
    %264 = vector.multi_reduction <maximumf>, %263, %cst_124 [1] : vector<16x16xf32> to vector<16xf32>
    %265 = vector.shape_cast %264 : vector<16xf32> to vector<16x1xf32>
    %266 = vector.broadcast %265 : vector<16x1xf32> to vector<16x16xf32>
    %267 = arith.subf %263, %266 : vector<16x16xf32>
    %268 = math.exp %267 : vector<16x16xf32>
    %cst_125 = arith.constant dense<0.000000e+00> : vector<16xf32>
    %269 = vector.multi_reduction <add>, %268, %cst_125 [1] : vector<16x16xf32> to vector<16xf32>
    %270 = vector.shape_cast %269 : vector<16xf32> to vector<16x1xf32>
    %271 = vector.broadcast %270 : vector<16x1xf32> to vector<16x16xf32>
    %272 = arith.divf %268, %271 : vector<16x16xf32>
    %cst_126 = arith.constant dense<0.000000e+00> : vector<16x8xf32>
    %273 = tpu.matmul %272, %260, %cst_126 {dimension_numbers = #tpu.dot_dimension_numbers<[1], [0], [0], [1], [0, 0, 1, 1], [], []>} : vector<16x16xf32>, vector<16x8xf32>, vector<16x8xf32> -> vector<16x8xf32>
    %274 = vector.extract_strided_slice %218 {offsets = [16, 0], sizes = [8, 32], strides = [1, 1]} : vector<32x32xf32> to vector<8x32xf32>
    %cst_127 = arith.constant dense<0.000000e+00> : vector<16x32xf32>
    %275 = tpu.matmul %273, %274, %cst_127 {dimension_numbers = #tpu.dot_dimension_numbers<[1], [0], [0], [1], [0, 0, 1, 1], [], []>} : vector<16x8xf32>, vector<8x32xf32>, vector<16x32xf32> -> vector<16x32xf32>
    %276 = arith.addf %257, %275 : vector<16x32xf32>
    %277 = vector.extract_strided_slice %216 {offsets = [0, 24], sizes = [16, 8], strides = [1, 1]} : vector<16x96xf32> to vector<16x8xf32>
    %278 = vector.extract_strided_slice %216 {offsets = [0, 56], sizes = [16, 8], strides = [1, 1]} : vector<16x96xf32> to vector<16x8xf32>
    %279 = vector.extract_strided_slice %216 {offsets = [0, 88], sizes = [16, 8], strides = [1, 1]} : vector<16x96xf32> to vector<16x8xf32>
    %cst_128 = arith.constant dense<0.000000e+00> : vector<16x16xf32>
    %280 = tpu.matmul %277, %278, %cst_128 {dimension_numbers = #tpu.dot_dimension_numbers<[1], [1], [0], [0], [0, 0, 1, 0], [], []>} : vector<16x8xf32>, vector<16x8xf32>, vector<16x16xf32> -> vector<16x16xf32>
    %cst_129 = arith.constant 0.353553385 : f32
    %281 = vector.broadcast %cst_129 : f32 to vector<16x16xf32>
    %282 = arith.mulf %280, %281 : vector<16x16xf32>
    %cst_130 = arith.constant dense<0xFF800000> : vector<16xf32>
    %283 = vector.multi_reduction <maximumf>, %282, %cst_130 [1] : vector<16x16xf32> to vector<16xf32>
    %284 = vector.shape_cast %283 : vector<16xf32> to vector<16x1xf32>
    %285 = vector.broadcast %284 : vector<16x1xf32> to vector<16x16xf32>
    %286 = arith.subf %282, %285 : vector<16x16xf32>
    %287 = math.exp %286 : vector<16x16xf32>
    %cst_131 = arith.constant dense<0.000000e+00> : vector<16xf32>
    %288 = vector.multi_reduction <add>, %287, %cst_131 [1] : vector<16x16xf32> to vector<16xf32>
    %289 = vector.shape_cast %288 : vector<16xf32> to vector<16x1xf32>
    %290 = vector.broadcast %289 : vector<16x1xf32> to vector<16x16xf32>
    %291 = arith.divf %287, %290 : vector<16x16xf32>
    %cst_132 = arith.constant dense<0.000000e+00> : vector<16x8xf32>
    %292 = tpu.matmul %291, %279, %cst_132 {dimension_numbers = #tpu.dot_dimension_numbers<[1], [0], [0], [1], [0, 0, 1, 1], [], []>} : vector<16x16xf32>, vector<16x8xf32>, vector<16x8xf32> -> vector<16x8xf32>
    %293 = vector.extract_strided_slice %218 {offsets = [24, 0], sizes = [8, 32], strides = [1, 1]} : vector<32x32xf32> to vector<8x32xf32>
    %cst_133 = arith.constant dense<0.000000e+00> : vector<16x32xf32>
    %294 = tpu.matmul %292, %293, %cst_133 {dimension_numbers = #tpu.dot_dimension_numbers<[1], [0], [0], [1], [0, 0, 1, 1], [], []>} : vector<16x8xf32>, vector<8x32xf32>, vector<16x32xf32> -> vector<16x32xf32>
    %295 = arith.addf %276, %294 : vector<16x32xf32>
    %296 = arith.addf %189, %295 : vector<16x32xf32>
    %c1_134 = arith.constant 1 : index
    %c0_135 = arith.constant 0 : index
    %c0_136 = arith.constant 0 : index
    %297 = vector.load %arg11[%c1_134, %c0_135, %c0_136] : memref<2x1x32xf32, #tpu.memory_space<vmem>>, vector<1x1x32xf32>
    %298 = vector.shape_cast %297 : vector<1x1x32xf32> to vector<1x32xf32>
    %299 = vector.broadcast %298 : vector<1x32xf32> to vector<16x32xf32>
    %300 = arith.addf %296, %299 : vector<16x32xf32>
    %c1_137 = arith.constant 1 : index
    %c0_138 = arith.constant 0 : index
    %c0_139 = arith.constant 0 : index
    %301 = vector.load %arg12[%c1_137, %c0_138, %c0_139] : memref<2x1x32xf32, #tpu.memory_space<vmem>>, vector<1x1x32xf32>
    %302 = vector.shape_cast %301 : vector<1x1x32xf32> to vector<1x32xf32>
    %c1_140 = arith.constant 1 : index
    %c0_141 = arith.constant 0 : index
    %c0_142 = arith.constant 0 : index
    %303 = vector.load %arg13[%c1_140, %c0_141, %c0_142] : memref<2x1x32xf32, #tpu.memory_space<vmem>>, vector<1x1x32xf32>
    %304 = vector.shape_cast %303 : vector<1x1x32xf32> to vector<1x32xf32>
    %cst_143 = arith.constant dense<0.000000e+00> : vector<16xf32>
    %305 = vector.multi_reduction <add>, %300, %cst_143 [1] : vector<16x32xf32> to vector<16xf32>
    %306 = vector.shape_cast %305 : vector<16xf32> to vector<16x1xf32>
    %cst_144 = arith.constant 3.200000e+01 : f32
    %307 = vector.broadcast %cst_144 : f32 to vector<16x1xf32>
    %308 = arith.divf %306, %307 : vector<16x1xf32>
    %309 = vector.broadcast %308 : vector<16x1xf32> to vector<16x32xf32>
    %310 = arith.subf %300, %309 : vector<16x32xf32>
    %311 = arith.mulf %310, %310 : vector<16x32xf32>
    %cst_145 = arith.constant dense<0.000000e+00> : vector<16xf32>
    %312 = vector.multi_reduction <add>, %311, %cst_145 [1] : vector<16x32xf32> to vector<16xf32>
    %313 = vector.shape_cast %312 : vector<16xf32> to vector<16x1xf32>
    %cst_146 = arith.constant 3.200000e+01 : f32
    %314 = vector.broadcast %cst_146 : f32 to vector<16x1xf32>
    %315 = arith.divf %313, %314 : vector<16x1xf32>
    %cst_147 = arith.constant 9.99999974E-6 : f32
    %316 = vector.broadcast %cst_147 : f32 to vector<16x1xf32>
    %317 = arith.addf %315, %316 : vector<16x1xf32>
    %318 = math.rsqrt %317 : vector<16x1xf32>
    %319 = vector.broadcast %318 : vector<16x1xf32> to vector<16x32xf32>
    %320 = arith.mulf %310, %319 : vector<16x32xf32>
    %321 = vector.broadcast %302 : vector<1x32xf32> to vector<16x32xf32>
    %322 = arith.mulf %320, %321 : vector<16x32xf32>
    %323 = vector.broadcast %304 : vector<1x32xf32> to vector<16x32xf32>
    %324 = arith.addf %322, %323 : vector<16x32xf32>
    %c1_148 = arith.constant 1 : index
    %c0_149 = arith.constant 0 : index
    %c0_150 = arith.constant 0 : index
    %325 = vector.load %arg14[%c1_148, %c0_149, %c0_150] : memref<2x32x32xf32, #tpu.memory_space<vmem>>, vector<1x32x32xf32>
    %326 = vector.shape_cast %325 : vector<1x32x32xf32> to vector<32x32xf32>
    %cst_151 = arith.constant dense<0.000000e+00> : vector<16x32xf32>
    %327 = tpu.matmul %324, %326, %cst_151 {dimension_numbers = #tpu.dot_dimension_numbers<[1], [0], [0], [1], [0, 0, 1, 1], [], []>} : vector<16x32xf32>, vector<32x32xf32>, vector<16x32xf32> -> vector<16x32xf32>
    %c1_152 = arith.constant 1 : index
    %c0_153 = arith.constant 0 : index
    %c0_154 = arith.constant 0 : index
    %328 = vector.load %arg15[%c1_152, %c0_153, %c0_154] : memref<2x1x32xf32, #tpu.memory_space<vmem>>, vector<1x1x32xf32>
    %329 = vector.shape_cast %328 : vector<1x1x32xf32> to vector<1x32xf32>
    %330 = vector.broadcast %329 : vector<1x32xf32> to vector<16x32xf32>
    %331 = arith.addf %327, %330 : vector<16x32xf32>
    %cst_155 = arith.constant 5.000000e-01 : f32
    %332 = vector.broadcast %cst_155 : f32 to vector<16x32xf32>
    %333 = arith.mulf %332, %331 : vector<16x32xf32>
    %cst_156 = arith.constant 4.471500e-02 : f32
    %334 = vector.broadcast %cst_156 : f32 to vector<16x32xf32>
    %335 = arith.mulf %334, %331 : vector<16x32xf32>
    %336 = arith.mulf %335, %331 : vector<16x32xf32>
    %337 = arith.mulf %336, %331 : vector<16x32xf32>
    %338 = arith.addf %331, %337 : vector<16x32xf32>
    %cst_157 = arith.constant 0.797884583 : f32
    %339 = vector.broadcast %cst_157 : f32 to vector<16x32xf32>
    %340 = arith.mulf %339, %338 : vector<16x32xf32>
    %341 = math.tanh %340 : vector<16x32xf32>
    %cst_158 = arith.constant 1.000000e+00 : f32
    %342 = vector.broadcast %cst_158 : f32 to vector<16x32xf32>
    %343 = arith.addf %342, %341 : vector<16x32xf32>
    %344 = arith.mulf %333, %343 : vector<16x32xf32>
    %c1_159 = arith.constant 1 : index
    %c0_160 = arith.constant 0 : index
    %c0_161 = arith.constant 0 : index
    %345 = vector.load %arg16[%c1_159, %c0_160, %c0_161] : memref<2x32x32xf32, #tpu.memory_space<vmem>>, vector<1x32x32xf32>
    %346 = vector.shape_cast %345 : vector<1x32x32xf32> to vector<32x32xf32>
    %cst_162 = arith.constant dense<0.000000e+00> : vector<16x32xf32>
    %347 = tpu.matmul %344, %346, %cst_162 {dimension_numbers = #tpu.dot_dimension_numbers<[1], [0], [0], [1], [0, 0, 1, 1], [], []>} : vector<16x32xf32>, vector<32x32xf32>, vector<16x32xf32> -> vector<16x32xf32>
    %c1_163 = arith.constant 1 : index
    %c0_164 = arith.constant 0 : index
    %c0_165 = arith.constant 0 : index
    %348 = vector.load %arg17[%c1_163, %c0_164, %c0_165] : memref<2x1x32xf32, #tpu.memory_space<vmem>>, vector<1x1x32xf32>
    %349 = vector.shape_cast %348 : vector<1x1x32xf32> to vector<1x32xf32>
    %350 = vector.broadcast %349 : vector<1x32xf32> to vector<16x32xf32>
    %351 = arith.addf %347, %350 : vector<16x32xf32>
    %352 = arith.addf %300, %351 : vector<16x32xf32>
    %c0_166 = arith.constant 0 : index
    %c0_167 = arith.constant 0 : index
    %c0_168 = arith.constant 0 : index
    %353 = vector.load %arg18[%c0_166, %c0_167, %c0_168] : memref<1x16x32xf32, #tpu.memory_space<vmem>>, vector<1x16x32xf32>
    %354 = vector.shape_cast %353 : vector<1x16x32xf32> to vector<16x32xf32>
    %355 = vector.shape_cast %352 : vector<16x32xf32> to vector<1x16x32xf32>
    tpu.vector_store %arg18[%c0_166, %c0_167, %c0_168], %355 {strides = array<i32>} : memref<1x16x32xf32, #tpu.memory_space<vmem>>, vector<1x16x32xf32>,
    return
  }
  func.func @transform_0(%arg0: i32) -> (i32, i32, i32) {
    %c0_i32 = arith.constant 0 : i32
    %c0_i32_0 = arith.constant 0 : i32
    %c0_i32_1 = arith.constant 0 : i32
    return %arg0, %c0_i32, %c0_i32_0 : i32, i32, i32
  }
  func.func @transform_1(%arg0: i32) -> (i32, i32) {
    %c0_i32 = arith.constant 0 : i32
    %c0_i32_0 = arith.constant 0 : i32
    %c0_i32_1 = arith.constant 0 : i32
    return %c0_i32, %c0_i32_0 : i32, i32
  }
  func.func @transform_2(%arg0: i32) -> (i32, i32) {
    %c0_i32 = arith.constant 0 : i32
    %c0_i32_0 = arith.constant 0 : i32
    %c0_i32_1 = arith.constant 0 : i32
    return %c0_i32, %c0_i32_0 : i32, i32
  }
  func.func @transform_3(%arg0: i32) -> (i32, i32) {
    %c0_i32 = arith.constant 0 : i32
    %c0_i32_0 = arith.constant 0 : i32
    %c0_i32_1 = arith.constant 0 : i32
    return %c0_i32, %c0_i32_0 : i32, i32
  }
  func.func @transform_4(%arg0: i32) -> (i32, i32) {
    %c0_i32 = arith.constant 0 : i32
    %c0_i32_0 = arith.constant 0 : i32
    %c0_i32_1 = arith.constant 0 : i32
    return %c0_i32, %c0_i32_0 : i32, i32
  }
  func.func @transform_5(%arg0: i32) -> (i32, i32) {
    %c0_i32 = arith.constant 0 : i32
    %c0_i32_0 = arith.constant 0 : i32
    %c0_i32_1 = arith.constant 0 : i32
    return %c0_i32, %c0_i32_0 : i32, i32
  }
  func.func @transform_6(%arg0: i32) -> (i32, i32, i32) {
    %c0_i32 = arith.constant 0 : i32
    %c0_i32_0 = arith.constant 0 : i32
    %c0_i32_1 = arith.constant 0 : i32
    %c0_i32_2 = arith.constant 0 : i32
    return %c0_i32, %c0_i32_0, %c0_i32_1 : i32, i32, i32
  }
  func.func @transform_7(%arg0: i32) -> (i32, i32, i32) {
    %c0_i32 = arith.constant 0 : i32
    %c0_i32_0 = arith.constant 0 : i32
    %c0_i32_1 = arith.constant 0 : i32
    %c0_i32_2 = arith.constant 0 : i32
    return %c0_i32, %c0_i32_0, %c0_i32_1 : i32, i32, i32
  }
  func.func @transform_8(%arg0: i32) -> (i32, i32, i32) {
    %c0_i32 = arith.constant 0 : i32
    %c0_i32_0 = arith.constant 0 : i32
    %c0_i32_1 = arith.constant 0 : i32
    %c0_i32_2 = arith.constant 0 : i32
    return %c0_i32, %c0_i32_0, %c0_i32_1 : i32, i32, i32
  }
  func.func @transform_9(%arg0: i32) -> (i32, i32, i32) {
    %c0_i32 = arith.constant 0 : i32
    %c0_i32_0 = arith.constant 0 : i32
    %c0_i32_1 = arith.constant 0 : i32
    %c0_i32_2 = arith.constant 0 : i32
    return %c0_i32, %c0_i32_0, %c0_i32_1 : i32, i32, i32
  }
  func.func @transform_10(%arg0: i32) -> (i32, i32, i32) {
    %c0_i32 = arith.constant 0 : i32
    %c0_i32_0 = arith.constant 0 : i32
    %c0_i32_1 = arith.constant 0 : i32
    %c0_i32_2 = arith.constant 0 : i32
    return %c0_i32, %c0_i32_0, %c0_i32_1 : i32, i32, i32
  }
  func.func @transform_11(%arg0: i32) -> (i32, i32, i32) {
    %c0_i32 = arith.constant 0 : i32
    %c0_i32_0 = arith.constant 0 : i32
    %c0_i32_1 = arith.constant 0 : i32
    %c0_i32_2 = arith.constant 0 : i32
    return %c0_i32, %c0_i32_0, %c0_i32_1 : i32, i32, i32
  }
  func.func @transform_12(%arg0: i32) -> (i32, i32, i32) {
    %c0_i32 = arith.constant 0 : i32
    %c0_i32_0 = arith.constant 0 : i32
    %c0_i32_1 = arith.constant 0 : i32
    %c0_i32_2 = arith.constant 0 : i32
    return %c0_i32, %c0_i32_0, %c0_i32_1 : i32, i32, i32
  }
  func.func @transform_13(%arg0: i32) -> (i32, i32, i32) {
    %c0_i32 = arith.constant 0 : i32
    %c0_i32_0 = arith.constant 0 : i32
    %c0_i32_1 = arith.constant 0 : i32
    %c0_i32_2 = arith.constant 0 : i32
    return %c0_i32, %c0_i32_0, %c0_i32_1 : i32, i32, i32
  }
  func.func @transform_14(%arg0: i32) -> (i32, i32, i32) {
    %c0_i32 = arith.constant 0 : i32
    %c0_i32_0 = arith.constant 0 : i32
    %c0_i32_1 = arith.constant 0 : i32
    %c0_i32_2 = arith.constant 0 : i32
    return %c0_i32, %c0_i32_0, %c0_i32_1 : i32, i32, i32
  }
  func.func @transform_15(%arg0: i32) -> (i32, i32, i32) {
    %c0_i32 = arith.constant 0 : i32
    %c0_i32_0 = arith.constant 0 : i32
    %c0_i32_1 = arith.constant 0 : i32
    %c0_i32_2 = arith.constant 0 : i32
    return %c0_i32, %c0_i32_0, %c0_i32_1 : i32, i32, i32
  }
  func.func @transform_16(%arg0: i32) -> (i32, i32, i32) {
    %c0_i32 = arith.constant 0 : i32
    %c0_i32_0 = arith.constant 0 : i32
    %c0_i32_1 = arith.constant 0 : i32
    %c0_i32_2 = arith.constant 0 : i32
    return %c0_i32, %c0_i32_0, %c0_i32_1 : i32, i32, i32
  }
  func.func @transform_17(%arg0: i32) -> (i32, i32, i32) {
    %c0_i32 = arith.constant 0 : i32
    %c0_i32_0 = arith.constant 0 : i32
    %c0_i32_1 = arith.constant 0 : i32
    return %arg0, %c0_i32, %c0_i32_0 : i32, i32, i32
  }
}

</mosaic_0001>

<bundles_post_ra>
// kernel: tpu_custom_call.1
= control target key start
LH: loop header
LB: loop body
LE: loop exit
PB: predicated region body
PF: predicated region fallthrough
CT: control target
= control target key end

     0   :  { %s6051_s0 = inlined_call_operand.vmem [shape: f32[2,16,8], index: 0, kind: input, shape index: {}]   ;;  %s6052_s1 = inlined_call_operand.vmem [shape: f32[8,32], index: 1, kind: input, shape index: {}]   ;;  %s6053_s2 = inlined_call_operand.hbm [shape: f32[1,32], index: 2, kind: input, shape index: {}]   ;;  %s6054_s3 = inlined_call_operand.hbm [shape: f32[32,32], index: 3, kind: input, shape index: {}]   ;;  %s6055_s4 = inlined_call_operand.hbm [shape: f32[1,32], index: 4, kind: input, shape index: {}]   ;;  %s6056_s5 = inlined_call_operand.hbm [shape: f32[16,32], index: 5, kind: input, shape index: {}]   ;;  %s6057_s6 = inlined_call_operand.vmem [shape: f32[2,1,32], index: 6, kind: input, shape index: {}]   ;;  %s6058_s7 = inlined_call_operand.vmem [shape: f32[2,1,32], index: 7, kind: input, shape index: {}]   ;;  %s6059_s8 = inlined_call_operand.vmem [shape: f32[2,32,96], index: 8, kind: input, shape index: {}]   ;;  %s6060_s9 = inlined_call_operand.hbm [shape: f32[2,32,32], index: 9, kind: input, shape index: {}]   ;;  %s6061_s10 = inlined_call_operand.vmem [shape: f32[2,1,32], index: 10, kind: input, shape index: {}]   ;;  %s6062_s11 = inlined_call_operand.vmem [shape: f32[2,1,32], index: 11, kind: input, shape index: {}]   ;;  %s6063_s12 = inlined_call_operand.vmem [shape: f32[2,1,32], index: 12, kind: input, shape index: {}]   ;;  %s6064_s13 = inlined_call_operand.hbm [shape: f32[2,32,32], index: 13, kind: input, shape index: {}]   ;;  %s6065_s14 = inlined_call_operand.vmem [shape: f32[2,1,32], index: 14, kind: input, shape index: {}]   ;;  %s6066_s15 = inlined_call_operand.hbm [shape: f32[2,32,32], index: 15, kind: input, shape index: {}]   ;;  %s6067_s16 = inlined_call_operand.vmem [shape: f32[2,1,32], index: 16, kind: input, shape index: {}]   ;;  %s6068_s17 = inlined_call_operand.hbm [shape: f32[2,16,32], index: 17, kind: output, shape index: {}]  }
   0x1   :  { %6087 = sst [smem:[#allocation28_spill]] %s6051_s0 }
   0x2   :  { %6088 = sst [smem:[#allocation29_spill]] %s6052_s1 }
   0x3   :  { %6089 = sst [smem:[#allocation30_spill]] %s6054_s3 }
   0x4   :  { %6090 = sst [smem:[#allocation31_spill]] %s6065_s14 }
   0x5   :  { %6091 = sst [smem:[#allocation32_spill]] %s6067_s16 }
   0x6   :  { %6092 = sst [smem:[#allocation33_spill]] %s6068_s17 }
   0x7   :  { %22 = vsyncpa [#allocation3], 0 }
   0x8   :  { %23 = vsyncpa [#allocation6], 0 }
   0x9   :  { %24 = vsyncpa [#allocation9], 0 }
   0xa   :  { %25 = vsyncpa [#allocation12], 0 }
   0xb   :  { %26 = vsyncpa [#allocation4], 0 }
   0xc   :  { %28 = vsyncpa [#allocation4 + $0x1], 0  ;;  %s5400_s24 = smov 0   ;;  %s5402_s25 = smov 0  }
   0xd   :  { %s5404_s26 = smov 0   ;;  %s5406_s27 = smov 0  }
   0xe LB: > { %6093 = sst [smem:[#allocation20_spill]] %s5273_s24  ;;  %s5421_s28 = sadd.s32 4294967295, %s5285_s27   ;;  %s5285_s27 = sphi %s5406_s27, %s6134_s27   ;;  %s5281_s26 = sphi %s5404_s26, %s6137_s26   ;;  %s5277_s25 = sphi %s5402_s25, %s6136_s25   ;;  %s5273_s24 = sphi %s5400_s24, %s6135_s24  }
   0xf   : > { %6094 = sst [smem:[#allocation21_spill]] %s5277_s25  ;;  %s4064_s29 = sadd.s32 4294967294, %s5285_s27  }
  0x10   : > { %6095 = sst [smem:[#allocation22_spill]] %s5281_s26  ;;  %s5425_s0 = sadd.s32 1, %s5285_s27  }
  0x11   : > { %6096 = sst [smem:[#allocation23_spill]] %s5285_s27  ;;  %s403_s30 = sadd.s32 1, %s5281_s26 }
  0x12   : > { %6097 = sst [smem:[#allocation24_spill]] %s5425_s0  ;;  %s400_s18 = ssub.s32 %s5285_s27, %s5425_s0 }
  0x13   : > { %p413_p0 = scmp.ne.s32.totalorder %s5281_s26, %s5277_s25  ;;  %p401_p1 = scmp.eq.s32.totalorder %s400_s18, 0 }
  0x14   : > { %p414_p2 = scmp.eq.s32.totalorder %s5421_s28, 1  ;;  %p419_p3 = scmp.ne.s32.totalorder %s5277_s25, %s5273_s24 }
  0x15   : > { %p420_p4 = scmp.eq.s32.totalorder %s4064_s29, 1  ;;  %p4065_p7 = scmp.ge.s32.totalorder %s5285_s27, 1 }
  0x16   : > { %s5436_s19 = scalar_select %p401_p1, %s5281_s26, %s403_s30  }
  0x17   : > { %p5438_p5 = por %p414_p2, %p413_p0  ;;  %p5442_p6 = por %p420_p4, %p419_p3 }
  0x18   : > { %6098 = sst [smem:[#allocation25_spill]] %s5436_s19  ;;  %p427_p8 = scmp.lt.s32.totalorder %s5285_s27, 3 }
  0x19   : > { %s6099_s1 = scalar_select %p5438_p5, 1, 0 }
  0x1a   : > { %s6101_s20 = scalar_select %p5442_p6, 1, 0 }
  0x1b   : > { %6100 = sst [smem:[#allocation26_spill]] %s6099_s1  ;;  %p6076_p9 = scmp.eq.s32.totalorder %s5421_s28, 0 }
  0x1c   : > { %6102 = sst [smem:[#allocation27_spill]] %s6101_s20  ;;  %p5449_p10 = pnand %p4065_p7, %p427_p8 }
  0x1d   : > { %s5287_s22 = smov [#allocation5]   ;;  %s5288_s30 = smov [#allocation8]  }
  0x1e   : > { %s6103_s21 = scalar_select %p5449_p10, 1, 0 }
  0x1f   : > { %s453_s23 = sshll.u32 %s5287_s22, 4  ;;  %p4744_p11 = pneg %p5449_p10  ;;  %s5455_s23 = int_to_ptr.vmem [resolvable:$true] %s453_s23 }
  0x20   : > { %s477_s18 = sshll.u32 %s5288_s30, 4  ;;  %s5289_s19 = smov [#allocation11]   ;;  %s5463_s18 = int_to_ptr.vmem [resolvable:$true] %s477_s18 }
  0x21   : > { %p5459_p12 = pnand %p6076_p9, %p4744_p11  ;;  %s5465_s26 = sshll.u32 %s5289_s19, 4  ;;  %s522_s26 = int_to_ptr.vmem [resolvable:$true] %s5465_s26 }
  0x22   : > { %s6105_s3 = sld [smem:[#allocation30_spill]] }
  0x23   : > { %p5475_p0 = pneg %p5459_p12 }
  0x28   : > { %s5011_s22 = scalar_lea.hbm %s6105_s3, 512 }
  0x29   : > { %p5012_p13 = scmp.ne.s32.totalorder %s6105_s3, %s5011_s22  ;;  %p5018_p3 = scmp.lt.u32.totalorder %s5011_s22, %s6105_s3 }
  0x2b   : > { %p5014_p1 = pnand %p5475_p0, %p5012_p13 }
  0x2d   : > { %p5015_p2 = pneg %p5014_p1 }
  0x2f   : > { %p5020_p4 = pnand %p5018_p3, %p5015_p2 }
  0x31   : > { %5023 = shalt.err (!%p5020_p4)
}
  0x32   : > { %s5024_s24 = scalar_lea.vmem %s5455_s23, 512  ;;  %p5032_p9 = scmp.lt.s32.totalorder %s5455_s23, %s5455_s23 }
  0x33   : > { %p5025_p7 = scmp.ne.s32.totalorder %s5455_s23, %s5024_s24  ;;  %p5033_p6 = scmp.lt.s32.totalorder %s5024_s24, %s5024_s24 }
  0x35   : > { %p5027_p8 = pnand %p5025_p7, %p5475_p0  ;;  %p5034_p13 = por %p5033_p6, %p5032_p9 }
  0x37   : > { %p5028_p11 = pneg %p5027_p8 }
  0x39   : > { %p5035_p1 = pnand %p5034_p13, %p5028_p11 }
  0x3b   : > { %5038 = shalt.err (!%p5035_p1)
}
  0x3c   : > { %s5290_s27 = smov 128   ;;  %s5291_s0 = smov 8  }
  0x3d   : > { %4750 = dma.hbm_to_vmem [thread:$0]  (!%p5459_p12), %s6105_s3, 512, %s5455_s23, [#allocation6], %s5290_s27, %s5290_s27, %s5291_s0  }
  0x3e   : > { %s5039_s24 = scalar_lea.hbm %s6056_s5, 256 }
  0x3f   : > { %p5040_p6 = scmp.ne.s32.totalorder %s6056_s5, %s5039_s24  ;;  %p5046_p3 = scmp.lt.u32.totalorder %s5039_s24, %s6056_s5 }
  0x41   : > { %p5042_p9 = pnand %p5040_p6, %p5475_p0 }
  0x43   : > { %p5043_p2 = pneg %p5042_p9 }
  0x45   : > { %p5048_p4 = pnand %p5046_p3, %p5043_p2 }
  0x47   : > { %5051 = shalt.err (!%p5048_p4)
}
  0x48   : > { %s5052_s23 = scalar_lea.vmem %s5463_s18, 256  ;;  %p5060_p13 = scmp.lt.s32.totalorder %s5463_s18, %s5463_s18 }
  0x49   : > { %p5053_p7 = scmp.ne.s32.totalorder %s5463_s18, %s5052_s23  ;;  %p5061_p1 = scmp.lt.s32.totalorder %s5052_s23, %s5052_s23 }
  0x4b   : > { %p5055_p8 = pnand %p5053_p7, %p5475_p0  ;;  %p5062_p6 = por %p5061_p1, %p5060_p13 }
  0x4d   : > { %p5056_p11 = pneg %p5055_p8 }
  0x4f   : > { %p5063_p9 = pnand %p5062_p6, %p5056_p11 }
  0x51   : > { %5066 = shalt.err (!%p5063_p9)
}
  0x52   : > { %4756 = dma.hbm_to_vmem [thread:$0]  (!%p5459_p12), %s6056_s5, 256, %s5463_s18, [#allocation9], %s5290_s27, %s5290_s27, %s5291_s0  }
  0x53   : > { %s5067_s20 = scalar_lea.hbm %s6064_s13, 1024 }
  0x54   : > { %p5068_p2 = scmp.ne.s32.totalorder %s6064_s13, %s5067_s20  ;;  %p5074_p7 = scmp.lt.u32.totalorder %s5067_s20, %s6064_s13 }
  0x56   : > { %p5070_p3 = pnand %p5068_p2, %p5475_p0 }
  0x58   : > { %p5071_p4 = pneg %p5070_p3 }
  0x5a   : > { %p5076_p8 = pnand %p5074_p7, %p5071_p4 }
  0x5c   : > { %5079 = shalt.err (!%p5076_p8)
}
  0x5d   : > { %s5080_s23 = scalar_lea.vmem %s522_s26, 1024  ;;  %p5088_p6 = scmp.lt.s32.totalorder %s522_s26, %s522_s26 }
  0x5e   : > { %p5081_p11 = scmp.ne.s32.totalorder %s522_s26, %s5080_s23  ;;  %p5089_p9 = scmp.lt.s32.totalorder %s5080_s23, %s5080_s23 }
  0x60   : > { %p5083_p13 = pnand %p5081_p11, %p5475_p0  ;;  %p5090_p5 = por %p5089_p9, %p5088_p6 }
  0x62   : > { %p5084_p1 = pneg %p5083_p13 }
  0x64   : > { %p5091_p10 = pnand %p5090_p5, %p5084_p1 }
  0x66   : > { %5094 = shalt.err (!%p5091_p10)
}
  0x67   : > { %4762 = dma.hbm_to_vmem [thread:$0]  (!%p5459_p12), %s6064_s13, 1024, %s522_s26, [#allocation12], %s5290_s27, %s5290_s27, %s5291_s0  }
  0x68   : > { %s5292_s16 = smov [#allocation2]   ;;  %s5293_s1 = smov [#allocation7]  }
  0x69   : > { %s443_s25 = sshll.u32 %s5292_s16, 4  ;;  %s467_s20 = sshll.u32 %s5293_s1, 4  ;;  %s444_s25 = int_to_ptr.vmem [resolvable:$true] %s443_s25  ;;  %s468_s20 = int_to_ptr.vmem [resolvable:$true] %s467_s20 }
  0x6a   : > { %s5095_s19 = scalar_lea.hbm %s6053_s2, 16 }
  0x6b   : > { %p5096_p5 = scmp.ne.s32.totalorder %s6053_s2, %s5095_s19  ;;  %p5102_p3 = scmp.lt.u32.totalorder %s5095_s19, %s6053_s2 }
  0x6d   : > { %p5098_p10 = pnand %p5096_p5, %p5475_p0 }
  0x6f   : > { %p5099_p2 = pneg %p5098_p10 }
  0x71   : > { %p5104_p4 = pnand %p5102_p3, %p5099_p2 }
  0x73   : > { %5107 = shalt.err (!%p5104_p4)
}
  0x74   : > { %s5108_s26 = scalar_lea.vmem %s444_s25, 16  ;;  %s5115_s14 = scalar_lea.vmem %s444_s25, 32 }
  0x75   : > { %p5109_p7 = scmp.ne.s32.totalorder %s444_s25, %s5108_s26  ;;  %p5116_p13 = scmp.lt.s32.totalorder %s444_s25, %s444_s25 }
  0x76   : > { %p5117_p1 = scmp.lt.s32.totalorder %s5115_s14, %s5108_s26 }
  0x77   : > { %p5111_p8 = pnand %p5109_p7, %p5475_p0 }
  0x78   : > { %p5118_p6 = por %p5117_p1, %p5116_p13 }
  0x79   : > { %p5112_p11 = pneg %p5111_p8 }
  0x7b   : > { %p5119_p9 = pnand %p5118_p6, %p5112_p11 }
  0x7d   : > { %5122 = shalt.err (!%p5119_p9)
}
  0x7e   : > { %4747 = dma.hbm_to_vmem [thread:$0]  (!%p5459_p12), %s6053_s2, 16, %s444_s25, [#allocation3]  }
  0x7f   : > { %s5123_s30 = scalar_lea.hbm %s6055_s4, 16 }
  0x80   : > { %p5124_p5 = scmp.ne.s32.totalorder %s6055_s4, %s5123_s30  ;;  %p5130_p3 = scmp.lt.u32.totalorder %s5123_s30, %s6055_s4 }
  0x82   : > { %p5126_p10 = pnand %p5124_p5, %p5475_p0 }
  0x84   : > { %p5127_p2 = pneg %p5126_p10 }
  0x86   : > { %p5132_p4 = pnand %p5130_p3, %p5127_p2 }
  0x88   : > { %5135 = shalt.err (!%p5132_p4)
}
  0x89   : > { %s5136_s26 = scalar_lea.vmem %s468_s20, 16  ;;  %s5143_s25 = scalar_lea.vmem %s468_s20, 32 }
  0x8a   : > { %p5137_p7 = scmp.ne.s32.totalorder %s468_s20, %s5136_s26  ;;  %p5144_p13 = scmp.lt.s32.totalorder %s468_s20, %s468_s20 }
  0x8b   : > { %p5145_p1 = scmp.lt.s32.totalorder %s5143_s25, %s5136_s26 }
  0x8c   : > { %p5139_p8 = pnand %p5137_p7, %p5475_p0 }
  0x8d   : > { %p5146_p6 = por %p5145_p1, %p5144_p13 }
  0x8e   : > { %p5140_p11 = pneg %p5139_p8 }
  0x90   : > { %p5147_p9 = pnand %p5146_p6, %p5140_p11 }
  0x92   : > { %5150 = shalt.err (!%p5147_p9)
}
  0x93   : > { %4753 = dma.hbm_to_vmem [thread:$0]  (!%p5459_p12), %s6055_s4, 16, %s468_s20, [#allocation6]  }
  0x94   : > { %s5294_s1 = smov [#allocation10]   ;;  %s5295_s22 = smov [#allocation13]  }
  0x95   : > { %s499_s3 = sshll.u32 %s5294_s1, 4  ;;  %s537_s30 = sshll.u32 %s5295_s22, 4  ;;  %s500_s3 = int_to_ptr.vmem [resolvable:$true] %s499_s3  ;;  %s538_s30 = int_to_ptr.vmem [resolvable:$true] %s537_s30 }
  0x96   : > { %s5151_s23 = scalar_lea.hbm %s6060_s9, 1024 }
  0x97   : > { %p5152_p5 = scmp.ne.s32.totalorder %s6060_s9, %s5151_s23  ;;  %p5158_p3 = scmp.lt.u32.totalorder %s5151_s23, %s6060_s9 }
  0x99   : > { %p5154_p10 = pnand %p5152_p5, %p5475_p0 }
  0x9b   : > { %p5155_p2 = pneg %p5154_p10 }
  0x9d   : > { %p5160_p4 = pnand %p5158_p3, %p5155_p2 }
  0x9f   : > { %5163 = shalt.err (!%p5160_p4)
}
  0xa0   : > { %s5164_s20 = scalar_lea.vmem %s500_s3, 1024  ;;  %p5172_p13 = scmp.lt.s32.totalorder %s500_s3, %s500_s3 }
  0xa1   : > { %p5165_p7 = scmp.ne.s32.totalorder %s500_s3, %s5164_s20  ;;  %p5173_p1 = scmp.lt.s32.totalorder %s5164_s20, %s5164_s20 }
  0xa3   : > { %p5167_p8 = pnand %p5165_p7, %p5475_p0  ;;  %p5174_p6 = por %p5173_p1, %p5172_p13 }
  0xa5   : > { %p5168_p11 = pneg %p5167_p8 }
  0xa7   : > { %p5175_p9 = pnand %p5174_p6, %p5168_p11 }
  0xa9   : > { %5178 = shalt.err (!%p5175_p9)
}
  0xaa   : > { %4759 = dma.hbm_to_vmem [thread:$0]  (!%p5459_p12), %s6060_s9, 1024, %s500_s3, [#allocation9], %s5290_s27, %s5290_s27, %s5291_s0  }
  0xab   : > { %s5179_s24 = scalar_lea.hbm %s6066_s15, 1024 }
  0xac   : > { %p5180_p5 = scmp.ne.s32.totalorder %s6066_s15, %s5179_s24  ;;  %p5186_p3 = scmp.lt.u32.totalorder %s5179_s24, %s6066_s15 }
  0xae   : > { %p5182_p10 = pnand %p5180_p5, %p5475_p0 }
  0xb0   : > { %p5183_p2 = pneg %p5182_p10 }
  0xb2   : > { %p5188_p4 = pnand %p5186_p3, %p5183_p2 }
  0xb4   : > { %5191 = shalt.err (!%p5188_p4)
}
  0xb5   : > { %s5192_s14 = scalar_lea.vmem %s538_s30, 1024  ;;  %p5200_p13 = scmp.lt.s32.totalorder %s538_s30, %s538_s30 }
  0xb6   : > { %p5193_p7 = scmp.ne.s32.totalorder %s538_s30, %s5192_s14  ;;  %p5201_p1 = scmp.lt.s32.totalorder %s5192_s14, %s5192_s14 }
  0xb8   : > { %p5195_p8 = pnand %p5193_p7, %p5475_p0  ;;  %p5202_p6 = por %p5201_p1, %p5200_p13 }
  0xba   : > { %p5196_p11 = pneg %p5195_p8 }
  0xbc   : > { %p5203_p9 = pnand %p5202_p6, %p5196_p11 }
  0xbe   : > { %5206 = shalt.err (!%p5203_p9)
}
  0xbf   : > { %4765 = dma.hbm_to_vmem [thread:$0]  (!%p5459_p12), %s6066_s15, 1024, %s538_s30, [#allocation12], %s5290_s27, %s5290_s27, %s5291_s0  }
  0xc0   : > { %p6107_p5 = scmp.ne.s32.totalorder %s6103_s21, 0 }
  0xc1   : > { %p6108_p0 = scmp.eq.s32.totalorder (!%p6107_p5), %s5421_s28, 0 }
  0xc2   : > { %564 = sbr.rel (%p6107_p5) target bundleno = 7791 (0x1e6f), region = 88 }
  0xc9   : > { %5252 = dma.done.wait (%p6108_p0), [#allocation3], 16   ;;  %p6109_p10 = pmov %p6108_p0 }
  0xca   : > { %p6110_p2 = pmov %p6108_p0 }
  0xcb   : > { %5254 = vsyncadd (%p6109_p10), [#allocation3], 4294967280 }
  0xcc   : > { %5256 = dma.done.wait (%p6110_p2), [#allocation6], 528   ;;  %p6111_p3 = pmov %p6108_p0 }
  0xcd   : > { %p6112_p4 = pmov %p6108_p0 }
  0xce   : > { %5258 = vsyncadd (%p6111_p3), [#allocation6], 4294966768 }
  0xcf   : > { %5260 = dma.done.wait (%p6112_p4), [#allocation9], 1280   ;;  %p6113_p12 = pmov %p6108_p0 }
  0xd0   : > { %p6114_p7 = pmov %p6108_p0 }
  0xd1   : > { %5262 = vsyncadd (%p6113_p12), [#allocation9], 4294966016 }
  0xd2   : > { %5264 = dma.done.wait (%p6114_p7), [#allocation12], 2048   ;;  %p6115_p8 = pmov %p6108_p0 }
  0xd3   : > { %p640_p11 = scmp.lt.s32.totalorder %s5421_s28, 1  ;;  %s6116_s0 = sld [smem:[#allocation28_spill]]  ;;  %vm655_vm0 = vcmask 64512   ;;  %v755_v3 = vld [vmem:[#allocation5] sm:$0xff]  ;;  %v756_v4 = vld [vmem:[#allocation5 + $0x8] sm:$0xff]  ;;  %v757_v5 = vld [vmem:[#allocation5 + $0x10] sm:$0xff] }
  0xd4   : > { %5266 = vsyncadd (%p6115_p8), [#allocation12], 4294965248  ;;  %s6117_s22 = sld [smem:[#allocation29_spill]]  ;;  %v4566_v6 = vpack.c.bf16 %v756_v4, %v755_v3  ;;  %v758_v7 = vld [vmem:[#allocation5 + $0x18] sm:$0xff]  ;;  %vm766_vm1 = vcmask 261120   ;;  %v848_v35 = vld [vmem:[#allocation8] sm:$0xff] }
  0xd5   : > { %s641_s17 = scalar_select %p640_p11, %s5421_s28, 1  ;;  %v4570_v8 = vpack.c.bf16 %v758_v7, %v757_v5  ;;  %v4085_v9 = vld [vmem:[#allocation2] ss:$0 sm:$0xff]  ;;  %v4088_v32 = vld [vmem:[#allocation7] ss:$0 sm:$0xff]  ;;  %v849_v38 = vld [vmem:[#allocation8 + $0x8] sm:$0xff] }
  0xd6   : > { %4567 = vmatprep.subr.bf16.mxu1 %v4566_v6  ;;  %v897_v53 = vld [vmem:[%s6059_s8] sm:$0xff]  ;;  %v898_v54 = vld [vmem:[%s6059_s8 + $0x8] sm:$0xff]  ;;  %v899_v56 = vld [vmem:[%s6059_s8 + $0x10] sm:$0xff]  ;;  %s5296_s27 = smov 96   ;;  %vm1077_vm3 = vcmask 130048   ;;  %s5299_s16 = smov 64  }
  0xd7   : > { %s4197_s21 = sshll.u32 %s641_s17, 4  ;;  %4569 = vmatpush3.bf16.msra.mxu1 %v4566_v6  ;;  %v4574_v55 = vpack.c.bf16 %v898_v54, %v897_v53  ;;  %v900_v57 = vld [vmem:[%s6059_s8 + $0x18] sm:$0xff]  ;;  %v4092_v4 = vld [vmem:[%s6058_s7] ss:$0 sm:$0xff]  ;;  %vm5707_vm2 = vmpackc.low %vm655_vm0, %vm655_vm0  ;;  %s6086_s1 = smov 56  }
  0xd8   : > { %4571 = vmatprep.subr.bf16.mxu1 %v4570_v8  ;;  %v4578_v58 = vpack.c.bf16 %v900_v57, %v899_v56  ;;  %s5302_s19 = smov 72   ;;  %s5303_s24 = smov 104  }
  0xd9   : > { %s644_s30 = scalar_lea.vmem %s6116_s0, %s4197_s21  ;;  %s5297_s0 = smov 88  }
  0xda   : > { %v647_v0 = vld [vmem:[%s6117_s22] sm:$0xff]  ;;  %v646_v2 = vld [vmem:[%s644_s30 + $0x8] sm:$0xff]  ;;  %s5301_s22 = smov 112   ;;  %s5304_s23 = smov 80  }
  0xdb   : > { %v645_v1 = vld [vmem:[%s644_s30] sm:$0xff]  ;;  %4332 = vmatprep.subr.mxu0 %v647_v0  ;;  %4573 = vmatpush3.bf16.msra.mxu1 %v4570_v8  ;;  %s5298_s30 = smov 120   ;;  %s6085_s18 = smov 48  }
  0xdc   : > { %4334 = vmatprep.mubr.msk.f32.mxu0 %vm655_vm0, %v645_v1  ;;  %4333 = vmatpush3.msra.mxu0 %v647_v0  ;;  %s6084_s26 = smov 40   ;;  %s6120_s14 = sld [smem:[#allocation31_spill]] }
  0xdd   : > { %4335 = vmatmul.mubr.msk.f32.vlgmr.msra.gmra.mrb[0].mxu0 %vm655_vm0, %v646_v2  ;;  %4575 = vmatprep.subr.bf16.mxu0 %v4574_v55  ;;  %v4091_v2 = vld [vmem:[%s6057_s6] ss:$0 sm:$0xff]  ;;  %s6121_s17 = sld [smem:[#allocation32_spill]]  ;;  %s6125_s20 = sld [smem:[#allocation21_spill]] }
  0xde   : > { %4577 = vmatpush3.bf16.msra.mxu0 %v4574_v55  ;;  %s5307_s3 = smov [#allocation14]  }
  0xdf   : > { %4579 = vmatprep.subr.bf16.mxu0 %v4578_v58 }
  0xe2   : > { %4581 = vmatpush3.bf16.msra.mxu0 %v4578_v58 }
  0xe3   : > { %s637_s21 = sand.u32 1, %s6125_s20   ;;  %s5211_s20 = sshll.u32 %s5307_s3, 4  ;;  %s5212_s20 = int_to_ptr.vmem [resolvable:$false] %s5211_s20 }
  0xe4   : > { %s4082_s29 = sshll.u32 %s637_s21, 4 }
 0x1b0   : > { %v4336_v10 = vpop.f32.mrb[0].mxu0 }
 0x1b1   : > { %v734_v11 = vadd.f32 %v4336_v10, %v4085_v9  ;;  %v728_v12 = vpop.f32.mrb[1].mxu0 }
 0x1b2   : > { %v729_v13 = vadd.f32 %v4085_v9, %v728_v12 }
 0x1b3   : > { %v740_v14 = vmul.f32 0.044715, %v734_v11  ;;  %v738_v29 = vmul.f32 0.5, %v734_v11 }
 0x1b4   : > { %v739_v15 = vmul.f32 0.044715, %v729_v13  ;;  %v737_v27 = vmul.f32 0.5, %v729_v13 }
 0x1b5   : > { %v742_v16 = vmul.f32 %v740_v14, %v734_v11 }
 0x1b6   : > { %v741_v17 = vmul.f32 %v739_v15, %v729_v13 }
 0x1b7   : > { %v744_v18 = vmul.f32 %v742_v16, %v734_v11 }
 0x1b8   : > { %v743_v19 = vmul.f32 %v741_v17, %v729_v13 }
 0x1b9   : > { %v746_v20 = vadd.f32 %v744_v18, %v734_v11 }
 0x1ba   : > { %v745_v21 = vadd.f32 %v743_v19, %v729_v13 }
 0x1bb   : > { %v748_v22 = vmul.f32 0.7978846, %v746_v20 }
 0x1bc   : > { %v747_v23 = vmul.f32 0.7978846, %v745_v21 }
 0x1bd   : > { %4919 = vtanh.f32 %v748_v22 }
 0x1be   : > { %4921 = vtanh.f32 %v747_v23 }
 0x1c7   : > { %v4920_v24 = vpop.eup %4919 }
 0x1c8   : > { %v4922_v25 = vpop.eup %4921  ;;  %v752_v26 = vadd.f32 1.0, %v4920_v24 }
 0x1c9   : > { %v751_v28 = vadd.f32 1.0, %v4922_v25 }
 0x1ca   : > { %v754_v31 = vmul.f32 %v752_v26, %v738_v29 }
 0x1cb   : > { %v753_v30 = vmul.f32 %v751_v28, %v737_v27 }
 0x1cd   : > { %4345 = vmatprep.mubr.msk.f32.mxu1 %vm766_vm1, %v753_v30 }
 0x1ce   : > { %4346 = vmatmul.mubr.msk.f32.vlgmr.msra.gmra.mrb[0].mxu1 %vm766_vm1, %v754_v31 }
 0x2a1   : > { %v4347_v33 = vpop.f32.mrb[0].mxu1 }
 0x2a2   : > { %v839_v34 = vpop.f32.mrb[1].mxu1  ;;  %v845_v36 = vadd.f32 %v4347_v33, %v4088_v32 }
 0x2a3   : > { %v840_v37 = vadd.f32 %v4088_v32, %v839_v34 }
 0x2a4   : > { %v5657_v40 = vadd.f32 %v849_v38, %v845_v36 }
 0x2a5   : > { %v5655_v39 = vadd.f32 %v848_v35, %v840_v37 }
 0x2a6   : > { %v857_v42 = vsel %vm766_vm1, %v5657_v40, 0.0 }
 0x2a7   : > { %v854_v41 = vsel %vm766_vm1, %v5655_v39, 0.0 }
 0x2a8   : > { %855 = vadd.xlane.f32.xlu0 %v854_v41 }
 0x2ac   : > { %858 = vadd.xlane.f32.xlu0 %v857_v42 }
 0x335   : > { %v856_v43 = vpop.xlane.xlu0 %855 }
 0x336   : > { %v861_v44 = vmul.f32 0.03125, %v856_v43 }
 0x338   : > { %v863_v45 = vsub.f32 %v5655_v39, %v861_v44 }
 0x339   : > { %v859_v46 = vpop.xlane.xlu0 %858 }
 0x33a   : > { %v862_v47 = vmul.f32 0.03125, %v859_v46  ;;  %v865_v48 = vmul.f32 %v863_v45, %v863_v45 }
 0x33c   : > { %v864_v49 = vsub.f32 %v5657_v40, %v862_v47  ;;  %v867_v50 = vsel %vm766_vm1, %v865_v48, 0.0 }
 0x33d   : > { %868 = vadd.xlane.f32.xlu1 %v867_v50 }
 0x33e   : > { %v866_v51 = vmul.f32 %v864_v49, %v864_v49 }
 0x340   : > { %v870_v52 = vsel %vm766_vm1, %v866_v51, 0.0 }
 0x341   : > { %871 = vadd.xlane.f32.xlu1 %v870_v52 }
 0x3ca   : > { %v869_v59 = vpop.xlane.xlu1 %868 }
 0x3cb   : > { %v873_v60 = vmul.f32 0.03125, %v869_v59 }
 0x3cd   : > { %v875_v61 = vadd.f32 1e-05, %v873_v60 }
 0x3ce   : > { %v872_v62 = vpop.xlane.xlu1 %871 }
 0x3cf   : > { %4923 = vrsqrt.f32 %v875_v61  ;;  %v874_v63 = vmul.f32 0.03125, %v872_v62 }
 0x3d1   : > { %v876_v0 = vadd.f32 1e-05, %v874_v63 }
 0x3d3   : > { %4925 = vrsqrt.f32 %v876_v0 }
 0x3d9   : > { %v4924_v1 = vpop.eup %4923 }
 0x3da   : > { %v879_v3 = vmul.f32 %v4924_v1, %v863_v45 }
 0x3dc   : > { %v887_v5 = vmul.f32 %v4091_v2, %v879_v3 }
 0x3dd   : > { %v4926_v6 = vpop.eup %4925 }
 0x3de   : > { %v880_v7 = vmul.f32 %v4926_v6, %v864_v49  ;;  %v895_v8 = vadd.f32 %v4092_v4, %v887_v5 }
 0x3e0   : > { %v888_v9 = vmul.f32 %v4091_v2, %v880_v7  ;;  %4356 = vmatprep.mubr.msk.f32.mxu0 %vm766_vm1, %v895_v8 }
 0x3e2   : > { %v896_v10 = vadd.f32 %v4092_v4, %v888_v9 }
 0x3e4   : > { %4357 = vmatmul.mubr.msk.f32.vlgmr.msra.gmra.mrb[2].mxu0 %vm766_vm1, %v896_v10 }
 0x4b7   : > { %v5687_v11 = vpop.f32.mrb[2].mxu0 }
 0x4b8   : > { %v5689_v12 = vpop.f32.mrb[3].mxu0 }
 0x4b9   : > { %4363 = vmatprep.mubr.msk.f32.mxu1 %vm655_vm0, %v5689_v12  ;;  %v5695_v13 = vpack.i.bf16 %v5687_v11, %v5689_v12 }
 0x4bb   : > { %4840 = vrot.lane.b32.xlu0 %v5695_v13, %s5296_s27 }
 0x4bf   : > { %4850 = vrot.lane.b32.xlu0 %v5695_v13, %s5297_s0 }
 0x4c3   : > { %1187 = vrot.lane.b32.xlu0 %v5689_v12, %s5298_s30 }
 0x4c7   : > { %1189 = vrot.lane.b32.xlu0 %v5687_v11, %s5298_s30 }
 0x52d   : > { %v4841_v14 = vpop.permute.xlu0 %4840 }
 0x52e   : > { %v4843_v15 = vunpack.i.h.bf16 %v4841_v14  ;;  %v4842_v16 = vunpack.i.l.bf16 %v4841_v14 }
 0x530   : > { %v4582_v18 = vpack.c.bf16 %v4843_v15, %v4842_v16 }
 0x531   : > { %v4851_v37 = vpop.permute.xlu0 %4850 }
 0x532   : > { %4584 = vmatprep.subr.msk.bf16.mxu1 %vm5707_vm2, %v4582_v18  ;;  %v4853_v41 = vunpack.i.h.bf16 %v4851_v37  ;;  %v4852_v42 = vunpack.i.l.bf16 %v4851_v37 }
 0x533   : > { %4587 = vmatpush3.bf16.xpose.msk.msra.mxu1 %vm5707_vm2, %v4582_v18 }
 0x534   : > { %v4592_v46 = vpack.c.bf16 %v4853_v41, %v4852_v42 }
 0x535   : > { %v1188_v51 = vpop.permute.xlu0 %1187 }
 0x539   : > { %v1190_v52 = vpop.permute.xlu0 %1189 }
 0x53a   : > { %4364 = vmatmul.mubr.msk.f32.vlgmr.msra.gmra.mrb[2].mxu1 %vm655_vm0, %v5687_v11 }
 0x60d   : > { %v4365_v19 = vpop.f32.mrb[2].mxu1 }
 0x60e   : > { %v1066_v20 = vpop.f32.mrb[3].mxu1  ;;  %v1076_v22 = vmul.f32 0.35355338, %v4365_v19 }
 0x60f   : > { %v1075_v21 = vmul.f32 0.35355338, %v1066_v20 }
 0x610   : > { %v1081_v24 = vsel %vm1077_vm3, %v1076_v22, -inf }
 0x611   : > { %v1078_v23 = vsel %vm1077_vm3, %v1075_v21, -inf }
 0x612   : > { %1079 = vmax.xlane.f32.xlu1 %v1078_v23 }
 0x616   : > { %1082 = vmax.xlane.f32.xlu1 %v1081_v24 }
 0x69f   : > { %v1080_v25 = vpop.xlane.xlu1 %1079 }
 0x6a0   : > { %v1084_v26 = vsub.f32 %v1075_v21, %v1080_v25 }
 0x6a2   : > { %v1086_v29 = vmul.f32 1.442695, %v1084_v26 }
 0x6a3   : > { %v1083_v27 = vpop.xlane.xlu1 %1082 }
 0x6a4   : > { %v1085_v28 = vsub.f32 %v1076_v22, %v1083_v27 }
 0x6a6   : > { %v1088_v30 = vmul.f32 1.442695, %v1085_v28 }
 0x6a8   : > { %4927 = vpow2.f32 %v1088_v30 }
 0x6a9   : > { %4929 = vpow2.f32 %v1086_v29 }
 0x6b2   : > { %v4928_v31 = vpop.eup %4927 }
 0x6b3   : > { %v1093_v32 = vsel %vm1077_vm3, %v4928_v31, 0.0  ;;  %v4930_v33 = vpop.eup %4929 }
 0x6b4   : > { %1094 = vadd.xlane.f32.xlu1 %v1093_v32  ;;  %v1090_v34 = vsel %vm1077_vm3, %v4930_v33, 0.0  ;;  %v982_v32 = vld [vmem:[#allocation10] sm:$0xff] }
 0x6b8   : > { %1091 = vadd.xlane.f32.xlu1 %v1090_v34 }
 0x6c9   : > { %4845 = vrot.lane.b32.xlu1 %v5695_v13, %s5299_s16 }
 0x741   : > { %v1095_v35 = vpop.xlane.xlu1 %1094 }
 0x742   : > { %4931 = vrcp.f32 %v1095_v35 }
 0x745   : > { %v1092_v36 = vpop.xlane.xlu1 %1091 }
 0x746   : > { %4933 = vrcp.f32 %v1092_v36 }
 0x749   : > { %v4846_v38 = vpop.permute.xlu1 %4845 }
 0x74a   : > { %v4848_v43 = vunpack.i.h.bf16 %v4846_v38  ;;  %v4847_v44 = vunpack.i.l.bf16 %v4846_v38 }
 0x74c   : > { %v4588_v45 = vpack.c.bf16 %v4848_v43, %v4847_v44  ;;  %v4932_v47 = vpop.eup %4931 }
 0x74d   : > { %v1099_v50 = vmul.f32 %v4932_v47, %v4928_v31  ;;  %v983_v31 = vld [vmem:[#allocation10 + $0x8] sm:$0xff] }
 0x74e   : > { %4589 = vmatprep.subr.bf16.mxu0 %v4588_v45  ;;  %4387 = vmatprep.subr.mxu1 %v983_v31 }
 0x74f   : > { %4591 = vmatpush3.bf16.msra.mxu0 %v4588_v45  ;;  %4388 = vmatpush3.msra.mxu1 %v983_v31 }
 0x750   : > { %v4934_v48 = vpop.eup %4933  ;;  %4594 = vmatprep.subr.msk.bf16.mxu0 %vm5707_vm2, %v4592_v46  ;;  %4392 = vmatprep.subr.mxu1 %v982_v32 }
 0x751   : > { %v1097_v49 = vmul.f32 %v4934_v48, %v4930_v33 }
 0x753   : > { %4370 = vmatprep.mubr.msk.f32.mxu0 %vm1077_vm3, %v1097_v49 }
 0x754   : > { %4371 = vmatmul.mubr.msk.f32.vlgmr.msra.gmra.mrb[4].mxu0 %vm1077_vm3, %v1099_v50 }
 0x755   : > { %4377 = vmatprep.mubr.msk.f32.mxu0 %vm655_vm0, %v1188_v51 }
 0x758   : > { %4597 = vmatpush3.bf16.xpose.msk.msra.mxu0 %vm5707_vm2, %v4592_v46 }
 0x75f   : > { %4378 = vmatmul.mubr.msk.f32.vlgmr.msra.gmra.mrb[6].mxu0 %vm655_vm0, %v1190_v52 }
 0x827   : > { %v5731_v53 = vpop.f32.mrb[4].mxu0 }
 0x828   : > { %v5733_v54 = vpop.f32.mrb[5].mxu0 }
 0x832   : > { %v4379_v55 = vpop.f32.mrb[6].mxu0 }
 0x833   : > { %v1279_v56 = vmul.f32 0.35355338, %v4379_v55  ;;  %v1269_v57 = vpop.f32.mrb[7].mxu0 }
 0x834   : > { %v1278_v58 = vmul.f32 0.35355338, %v1269_v57 }
 0x835   : > { %v1283_v59 = vsel %vm1077_vm3, %v1279_v56, -inf }
 0x836   : > { %1284 = vmax.xlane.f32.xlu0 %v1283_v59  ;;  %v1280_v60 = vsel %vm1077_vm3, %v1278_v58, -inf }
 0x837   : > { %1281 = vmax.xlane.f32.xlu1 %v1280_v60 }
 0x848   : > { %4855 = vrot.lane.b32.xlu1 %v5695_v13, %s6086_s1 }
 0x84c   : > { %1551 = vrot.lane.b32.xlu1 %v5689_v12, %s5301_s22 }
 0x850   : > { %1553 = vrot.lane.b32.xlu1 %v5687_v11, %s5301_s22 }
 0x854   : > { %4865 = vrot.lane.b32.xlu1 %v5695_v13, %s5302_s19 }
 0x858   : > { %1838 = vrot.lane.b32.xlu1 %v5687_v11, %s5303_s24 }
 0x8c3   : > { %v1285_v61 = vpop.xlane.xlu0 %1284 }
 0x8c4   : > { %v1287_v62 = vsub.f32 %v1279_v56, %v1285_v61  ;;  %v1282_v63 = vpop.xlane.xlu1 %1281 }
 0x8c5   : > { %v1286_v0 = vsub.f32 %v1278_v58, %v1282_v63 }
 0x8c6   : > { %v1290_v1 = vmul.f32 1.442695, %v1287_v62 }
 0x8c7   : > { %v1288_v2 = vmul.f32 1.442695, %v1286_v0 }
 0x8c8   : > { %4935 = vpow2.f32 %v1290_v1  ;;  %v4856_v3 = vpop.permute.xlu1 %4855 }
 0x8c9   : > { %v4858_v4 = vunpack.i.h.bf16 %v4856_v3  ;;  %v4857_v5 = vunpack.i.l.bf16 %v4856_v3  ;;  %4937 = vpow2.f32 %v1288_v2 }
 0x8cb   : > { %v4598_v6 = vpack.c.bf16 %v4858_v4, %v4857_v5 }
 0x8cc   : > { %v1552_v11 = vpop.permute.xlu1 %1551 }
 0x8cd   : > { %4599 = vmatprep.subr.bf16.mxu0 %v4598_v6 }
 0x8ce   : > { %4601 = vmatpush3.bf16.msra.mxu0 %v4598_v6 }
 0x8d0   : > { %v1554_v16 = vpop.permute.xlu1 %1553 }
 0x8d2   : > { %v4936_v7 = vpop.eup %4935 }
 0x8d3   : > { %v1295_v8 = vsel %vm1077_vm3, %v4936_v7, 0.0  ;;  %v4938_v9 = vpop.eup %4937 }
 0x8d4   : > { %1296 = vadd.xlane.f32.xlu0 %v1295_v8  ;;  %v1292_v10 = vsel %vm1077_vm3, %v4938_v9, 0.0  ;;  %v4866_v22 = vpop.permute.xlu1 %4865 }
 0x8d5   : > { %v4868_v25 = vunpack.i.h.bf16 %v4866_v22  ;;  %v4867_v26 = vunpack.i.l.bf16 %v4866_v22 }
 0x8d7   : > { %v4612_v28 = vpack.c.bf16 %v4868_v25, %v4867_v26 }
 0x8d8   : > { %1293 = vadd.xlane.f32.xlu0 %v1292_v10  ;;  %v1839_v30 = vpop.permute.xlu1 %1838 }
 0x8ee   : > { %4860 = vrot.lane.b32.xlu0 %v5695_v13, %s5304_s23 }
 0x8f2   : > { %1836 = vrot.lane.b32.xlu0 %v5689_v12, %s5303_s24 }
 0x961   : > { %v1297_v14 = vpop.xlane.xlu0 %1296 }
 0x962   : > { %4939 = vrcp.f32 %v1297_v14 }
 0x965   : > { %v1294_v15 = vpop.xlane.xlu0 %1293 }
 0x966   : > { %4941 = vrcp.f32 %v1294_v15 }
 0x969   : > { %v4861_v18 = vpop.permute.xlu0 %4860 }
 0x96a   : > { %v4863_v19 = vunpack.i.h.bf16 %v4861_v18  ;;  %v4862_v20 = vunpack.i.l.bf16 %v4861_v18 }
 0x96c   : > { %v4602_v21 = vpack.c.bf16 %v4863_v19, %v4862_v20  ;;  %v4940_v23 = vpop.eup %4939 }
 0x96d   : > { %v1301_v12 = vmul.f32 %v4940_v23, %v4936_v7  ;;  %v1837_v29 = vpop.permute.xlu0 %1836 }
 0x96e   : > { %4604 = vmatprep.subr.msk.bf16.mxu0 %vm5707_vm2, %v4602_v21 }
 0x970   : > { %v4942_v24 = vpop.eup %4941 }
 0x971   : > { %v1299_v27 = vmul.f32 %v4942_v24, %v4938_v9 }
 0x973   : > { %4384 = vmatprep.mubr.msk.f32.mxu0 %vm1077_vm3, %v1299_v27 }
 0x974   : > { %4385 = vmatmul.mubr.msk.f32.vlgmr.msra.gmra.mrb[8].mxu0 %vm1077_vm3, %v1301_v12 }
 0x975   : > { %4607 = vmatpush3.bf16.xpose.msk.msra.mxu0 %vm5707_vm2, %v4602_v21  ;;  %4401 = vmatprep.mubr.msk.f32.mxu0 %vm655_vm0, %v1552_v11  ;;  %v984_v11 = vld [vmem:[#allocation10 + $0x10] sm:$0xff] }
 0x976   : > { %4614 = vmatprep.subr.msk.bf16.mxu0 %vm5707_vm2, %v4612_v28 }
 0x97c   : > { %4402 = vmatmul.mubr.msk.f32.vlgmr.msra.gmra.mrb[10].mxu0 %vm655_vm0, %v1554_v16 }
 0x97d   : > { %4617 = vmatpush3.bf16.xpose.msk.msra.mxu0 %vm5707_vm2, %v4612_v28  ;;  %4420 = vmatprep.mubr.msk.f32.mxu0 %vm655_vm0, %v1837_v29  ;;  %v985_v28 = vld [vmem:[#allocation10 + $0x18] sm:$0xff] }
 0x984   : > { %4421 = vmatmul.mubr.msk.f32.vlgmr.msra.gmra.mrb[12].mxu0 %vm655_vm0, %v1839_v30 }
 0xa47   : > { %v4386_v33 = vpop.f32.mrb[8].mxu0 }
 0xa48   : > { %v1380_v34 = vpop.f32.mrb[9].mxu0 }
 0xa49   : > { %4389 = vmatprep.mubr.msk.f32.mxu1 %vm655_vm0, %v1380_v34 }
 0xa4a   : > { %4390 = vmatmul.mubr.msk.f32.vlgmr.msra.gmra.mrb[4].mxu1 %vm655_vm0, %v4386_v33  ;;  %v4127_v33 = vld [vmem:[%s6061_s10] ss:$0 sm:$0xff] }
 0xa4b   : > { %4394 = vmatprep.mubr.msk.f32.mxu1 %vm655_vm0, %v5733_v54  ;;  %4393 = vmatpush3.msra.mxu1 %v982_v32 }
 0xa4f   : > { %v4403_v35 = vpop.f32.mrb[10].mxu0 }
 0xa50   : > { %v1643_v36 = vmul.f32 0.35355338, %v4403_v35  ;;  %v1633_v37 = vpop.f32.mrb[11].mxu0 }
 0xa51   : > { %v1642_v38 = vmul.f32 0.35355338, %v1633_v37 }
 0xa52   : > { %v1647_v41 = vsel %vm1077_vm3, %v1643_v36, -inf  ;;  %4395 = vmatmul.mubr.msk.f32.vlgmr.msra.gmra.mrb[4].mxu1 %vm655_vm0, %v5731_v53 }
 0xa53   : > { %1648 = vmax.xlane.f32.xlu1 %v1647_v41  ;;  %v1644_v42 = vsel %vm1077_vm3, %v1642_v38, -inf }
 0xa54   : > { %1645 = vmax.xlane.f32.xlu0 %v1644_v42 }
 0xa57   : > { %v4422_v43 = vpop.f32.mrb[12].mxu0 }
 0xa58   : > { %v1918_v44 = vpop.f32.mrb[13].mxu0  ;;  %v1928_v46 = vmul.f32 0.35355338, %v4422_v43 }
 0xa59   : > { %v1927_v45 = vmul.f32 0.35355338, %v1918_v44 }
 0xa5a   : > { %v1932_v48 = vsel %vm1077_vm3, %v1928_v46, -inf }
 0xa5b   : > { %v1929_v47 = vsel %vm1077_vm3, %v1927_v45, -inf }
 0xa5c   : > { %1930 = vmax.xlane.f32.xlu1 %v1929_v47 }
 0xa60   : > { %1933 = vmax.xlane.f32.xlu1 %v1932_v48 }
 0xae0   : > { %v1649_v49 = vpop.xlane.xlu1 %1648 }
 0xae1   : > { %v1651_v50 = vsub.f32 %v1643_v36, %v1649_v49  ;;  %v1646_v51 = vpop.xlane.xlu0 %1645 }
 0xae2   : > { %v1650_v52 = vsub.f32 %v1642_v38, %v1646_v51  ;;  %v2176_v51 = vld [vmem:[#allocation11] sm:$0xff] }
 0xae3   : > { %v1654_v54 = vmul.f32 1.442695, %v1651_v50 }
 0xae4   : > { %v1652_v53 = vmul.f32 1.442695, %v1650_v52  ;;  %v2177_v52 = vld [vmem:[#allocation11 + $0x8] sm:$0xff] }
 0xae5   : > { %4943 = vpow2.f32 %v1654_v54  ;;  %v4622_v54 = vpack.c.bf16 %v2177_v52, %v2176_v51 }
 0xae6   : > { %4945 = vpow2.f32 %v1652_v53  ;;  %v2178_v53 = vld [vmem:[#allocation11 + $0x10] sm:$0xff] }
 0xae7   : > { %4623 = vmatprep.subr.bf16.mxu0 %v4622_v54 }
 0xae8   : > { %4625 = vmatpush3.bf16.msra.mxu0 %v4622_v54 }
 0xae9   : > { %v1931_v55 = vpop.xlane.xlu1 %1930 }
 0xaea   : > { %v1935_v56 = vsub.f32 %v1927_v45, %v1931_v55  ;;  %v2179_v55 = vld [vmem:[#allocation11 + $0x18] sm:$0xff] }
 0xaec   : > { %v1937_v60 = vmul.f32 1.442695, %v1935_v56  ;;  %v4626_v56 = vpack.c.bf16 %v2179_v55, %v2178_v53 }
 0xaed   : > { %v1934_v57 = vpop.xlane.xlu1 %1933 }
 0xaee   : > { %v1936_v58 = vsub.f32 %v1928_v46, %v1934_v57  ;;  %4627 = vmatprep.subr.bf16.mxu0 %v4626_v56 }
 0xaef   : > { %v4944_v59 = vpop.eup %4943  ;;  %4629 = vmatpush3.bf16.msra.mxu0 %v4626_v56 }
 0xaf0   : > { %v1939_v61 = vmul.f32 1.442695, %v1936_v58  ;;  %v1659_v62 = vsel %vm1077_vm3, %v4944_v59, 0.0  ;;  %v4946_v63 = vpop.eup %4945 }
 0xaf1   : > { %1660 = vadd.xlane.f32.xlu0 %v1659_v62  ;;  %v1656_v0 = vsel %vm1077_vm3, %v4946_v63, 0.0 }
 0xaf2   : > { %4947 = vpow2.f32 %v1939_v61 }
 0xaf3   : > { %4949 = vpow2.f32 %v1937_v60 }
 0xaf5   : > { %1657 = vadd.xlane.f32.xlu0 %v1656_v0  ;;  %v4128_v0 = vld [vmem:[%s6062_s11] ss:$0 sm:$0xff] }
 0xafc   : > { %v4948_v1 = vpop.eup %4947 }
 0xafd   : > { %v1944_v2 = vsel %vm1077_vm3, %v4948_v1, 0.0  ;;  %v4950_v3 = vpop.eup %4949 }
 0xafe   : > { %1945 = vadd.xlane.f32.xlu1 %v1944_v2  ;;  %v1941_v4 = vsel %vm1077_vm3, %v4950_v3, 0.0  ;;  %v4129_v2 = vld [vmem:[%s6063_s12] ss:$0 sm:$0xff] }
 0xb02   : > { %1942 = vadd.xlane.f32.xlu1 %v1941_v4 }
 0xb0b   : > { %4870 = vrot.lane.b32.xlu0 %v5695_v13, %s6085_s18 }
 0xb13   : > { %4875 = vrot.lane.b32.xlu1 %v5695_v13, %s6084_s26 }
 0xb7e   : > { %v1661_v5 = vpop.xlane.xlu0 %1660 }
 0xb7f   : > { %4951 = vrcp.f32 %v1661_v5 }
 0xb82   : > { %v1658_v6 = vpop.xlane.xlu0 %1657 }
 0xb83   : > { %4953 = vrcp.f32 %v1658_v6 }
 0xb86   : > { %v4871_v7 = vpop.permute.xlu0 %4870 }
 0xb87   : > { %v4873_v8 = vunpack.i.h.bf16 %v4871_v7  ;;  %v4872_v9 = vunpack.i.l.bf16 %v4871_v7 }
 0xb89   : > { %v4608_v10 = vpack.c.bf16 %v4873_v8, %v4872_v9  ;;  %v4952_v15 = vpop.eup %4951  ;;  %v2286_v9 = vld [vmem:[#allocation13] sm:$0xff] }
 0xb8a   : > { %v1665_v19 = vmul.f32 %v4952_v15, %v4944_v59  ;;  %v2289_v15 = vld [vmem:[#allocation13 + $0x18] sm:$0xff] }
 0xb8b   : > { %v1946_v14 = vpop.xlane.xlu1 %1945  ;;  %4609 = vmatprep.subr.bf16.mxu1 %v4608_v10 }
 0xb8c   : > { %4611 = vmatpush3.bf16.msra.mxu1 %v4608_v10  ;;  %v2287_v10 = vld [vmem:[#allocation13 + $0x8] sm:$0xff] }
 0xb8d   : > { %v4954_v16 = vpop.eup %4953  ;;  %4411 = vmatprep.subr.mxu1 %v984_v11 }
 0xb8e   : > { %v1663_v18 = vmul.f32 %v4954_v16, %v4946_v63 }
 0xb8f   : > { %v1943_v20 = vpop.xlane.xlu1 %1942 }
 0xb90   : > { %4408 = vmatprep.mubr.msk.f32.mxu1 %vm1077_vm3, %v1663_v18  ;;  %4955 = vrcp.f32 %v1943_v20  ;;  %v4130_v18 = vld [vmem:[%s6120_s14] ss:$0 sm:$0xff] }
 0xb91   : > { %4409 = vmatmul.mubr.msk.f32.vlgmr.msra.gmra.mrb[6].mxu1 %vm1077_vm3, %v1665_v19  ;;  %4957 = vrcp.f32 %v1946_v14  ;;  %v4630_v14 = vpack.c.bf16 %v2287_v10, %v2286_v9  ;;  %v4139_v9 = vld [vmem:[%s6058_s7 + $0x1] ss:$0 sm:$0xff] }
 0xb92   : > { %4412 = vmatpush3.msra.mxu1 %v984_v11  ;;  %v2288_v11 = vld [vmem:[#allocation13 + $0x10] sm:$0xff] }
 0xb93   : > { %v4876_v13 = vpop.permute.xlu1 %4875  ;;  %v4634_v16 = vpack.c.bf16 %v2289_v15, %v2288_v11 }
 0xb94   : > { %v4878_v21 = vunpack.i.h.bf16 %v4876_v13  ;;  %v4877_v22 = vunpack.i.l.bf16 %v4876_v13 }
 0xb96   : > { %v4618_v23 = vpack.c.bf16 %v4878_v21, %v4877_v22 }
 0xb98   : > { %4619 = vmatprep.subr.bf16.mxu1 %v4618_v23 }
 0xb9a   : > { %v4956_v24 = vpop.eup %4955 }
 0xb9b   : > { %v4958_v27 = vpop.eup %4957  ;;  %v1948_v12 = vmul.f32 %v4956_v24, %v4950_v3 }
 0xb9c   : > { %v1950_v29 = vmul.f32 %v4958_v27, %v4948_v1 }
 0xc64   : > { %v4410_v25 = vpop.f32.mrb[6].mxu1 }
 0xc65   : > { %v1744_v26 = vpop.f32.mrb[7].mxu1 }
 0xc66   : > { %4413 = vmatprep.mubr.msk.f32.mxu1 %vm655_vm0, %v1744_v26 }
 0xc67   : > { %4414 = vmatmul.mubr.msk.f32.vlgmr.msra.gmra.mrb[4].mxu1 %vm655_vm0, %v4410_v25 }
 0xc68   : > { %4621 = vmatpush3.bf16.msra.mxu1 %v4618_v23  ;;  %4427 = vmatprep.mubr.msk.f32.mxu1 %vm1077_vm3, %v1948_v12 }
 0xc69   : > { %4430 = vmatprep.subr.mxu1 %v985_v28 }
 0xc6b   : > { %4428 = vmatmul.mubr.msk.f32.vlgmr.msra.gmra.mrb[8].mxu1 %vm1077_vm3, %v1950_v29 }
 0xc6c   : > { %4431 = vmatpush3.msra.mxu1 %v985_v28 }
 0xc6d   : > { %4631 = vmatprep.subr.bf16.mxu1 %v4630_v14 }
 0xd3e   : > { %v4429_v30 = vpop.f32.mrb[8].mxu1 }
 0xd3f   : > { %v2029_v31 = vpop.f32.mrb[9].mxu1 }
 0xd40   : > { %4432 = vmatprep.mubr.msk.f32.mxu1 %vm655_vm0, %v2029_v31 }
 0xd41   : > { %4433 = vmatmul.mubr.msk.f32.vlgmr.msra.gmra.mrb[4].mxu1 %vm655_vm0, %v4429_v30 }
 0xd42   : > { %4633 = vmatpush3.bf16.msra.mxu1 %v4630_v14 }
 0xd43   : > { %4635 = vmatprep.subr.bf16.mxu1 %v4634_v16 }
 0xd46   : > { %4637 = vmatpush3.bf16.msra.mxu1 %v4634_v16 }
 0xe14   : > { %v4434_v32 = vpop.f32.mrb[4].mxu1 }
 0xe15   : > { %v2122_v34 = vadd.f32 %v4434_v32, %v5657_v40  ;;  %v2110_v35 = vpop.f32.mrb[5].mxu1 }
 0xe16   : > { %v2121_v36 = vadd.f32 %v2110_v35, %v5655_v39 }
 0xe17   : > { %v5798_v37 = vadd.f32 %v4127_v33, %v2122_v34 }
 0xe18   : > { %v5800_v38 = vadd.f32 %v4127_v33, %v2121_v36 }
 0xe19   : > { %v2137_v41 = vsel %vm766_vm1, %v5798_v37, 0.0 }
 0xe1a   : > { %2138 = vadd.xlane.f32.xlu1 %v2137_v41  ;;  %v2134_v42 = vsel %vm766_vm1, %v5800_v38, 0.0 }
 0xe1b   : > { %2135 = vadd.xlane.f32.xlu0 %v2134_v42 }
 0xea7   : > { %v2139_v43 = vpop.xlane.xlu1 %2138 }
 0xea8   : > { %v2141_v44 = vmul.f32 0.03125, %v2139_v43  ;;  %v2136_v45 = vpop.xlane.xlu0 %2135  ;;  %v4133_v43 = vld [vmem:[%s6121_s17] ss:$0 sm:$0xff] }
 0xea9   : > { %v2140_v46 = vmul.f32 0.03125, %v2136_v45 }
 0xeaa   : > { %v2143_v40 = vsub.f32 %v5798_v37, %v2141_v44 }
 0xeab   : > { %v2142_v39 = vsub.f32 %v5800_v38, %v2140_v46 }
 0xeac   : > { %v2145_v49 = vmul.f32 %v2143_v40, %v2143_v40 }
 0xead   : > { %v2144_v47 = vmul.f32 %v2142_v39, %v2142_v39 }
 0xeae   : > { %v2149_v50 = vsel %vm766_vm1, %v2145_v49, 0.0 }
 0xeaf   : > { %v2146_v48 = vsel %vm766_vm1, %v2144_v47, 0.0 }
 0xeb0   : > { %2147 = vadd.xlane.f32.xlu0 %v2146_v48 }
 0xeb4   : > { %2150 = vadd.xlane.f32.xlu0 %v2149_v50 }
 0xf3d   : > { %v2148_v57 = vpop.xlane.xlu0 %2147 }
 0xf3e   : > { %v2152_v58 = vmul.f32 0.03125, %v2148_v57 }
 0xf40   : > { %v2154_v59 = vadd.f32 1e-05, %v2152_v58  ;;  %v4140_v58 = vld [vmem:[%s6059_s8 + $0x20] sm:$0xff] }
 0xf41   : > { %v2151_v60 = vpop.xlane.xlu0 %2150 }
 0xf42   : > { %4959 = vrsqrt.f32 %v2154_v59  ;;  %v2153_v61 = vmul.f32 0.03125, %v2151_v60  ;;  %v4141_v59 = vld [vmem:[%s6059_s8 + $0x28] sm:$0xff] }
 0xf43   : > { %v4638_v60 = vpack.c.bf16 %v4141_v59, %v4140_v58 }
 0xf44   : > { %v2155_v62 = vadd.f32 1e-05, %v2153_v61  ;;  %v4142_v61 = vld [vmem:[%s6059_s8 + $0x30] sm:$0xff] }
 0xf45   : > { %4639 = vmatprep.subr.bf16.mxu0 %v4638_v60 }
 0xf46   : > { %4961 = vrsqrt.f32 %v2155_v62  ;;  %v4143_v62 = vld [vmem:[%s6059_s8 + $0x38] sm:$0xff] }
 0xf4c   : > { %v4960_v63 = vpop.eup %4959 }
 0xf4d   : > { %v2158_v1 = vmul.f32 %v4960_v63, %v2142_v39  ;;  %v4642_v63 = vpack.c.bf16 %v4143_v62, %v4142_v61 }
 0xf4f   : > { %v2166_v3 = vmul.f32 %v4128_v0, %v2158_v1 }
 0xf50   : > { %v4962_v4 = vpop.eup %4961 }
 0xf51   : > { %v2159_v5 = vmul.f32 %v4962_v4, %v2143_v40  ;;  %v2174_v6 = vadd.f32 %v4129_v2, %v2166_v3 }
 0xf53   : > { %v2167_v7 = vmul.f32 %v4128_v0, %v2159_v5  ;;  %4443 = vmatprep.mubr.msk.f32.mxu0 %vm766_vm1, %v2174_v6 }
 0xf55   : > { %v2175_v8 = vadd.f32 %v4129_v2, %v2167_v7  ;;  %v4138_v7 = vld [vmem:[%s6057_s6 + $0x1] ss:$0 sm:$0xff] }
 0xf57   : > { %4444 = vmatmul.mubr.msk.f32.vlgmr.msra.gmra.mrb[14].mxu0 %vm766_vm1, %v2175_v8 }
 0xf58   : > { %4641 = vmatpush3.bf16.msra.mxu0 %v4638_v60 }
 0xf59   : > { %4643 = vmatprep.subr.bf16.mxu0 %v4642_v63 }
 0xf5c   : > { %4645 = vmatpush3.bf16.msra.mxu0 %v4642_v63 }
0x102a   : > { %v4445_v19 = vpop.f32.mrb[14].mxu0 }
0x102b   : > { %v2265_v20 = vadd.f32 %v4445_v19, %v4130_v18  ;;  %v2259_v13 = vpop.f32.mrb[15].mxu0 }
0x102c   : > { %v2260_v21 = vadd.f32 %v4130_v18, %v2259_v13 }
0x102d   : > { %v2271_v22 = vmul.f32 0.044715, %v2265_v20  ;;  %v2269_v36 = vmul.f32 0.5, %v2265_v20 }
0x102e   : > { %v2270_v23 = vmul.f32 0.044715, %v2260_v21  ;;  %v2268_v34 = vmul.f32 0.5, %v2260_v21 }
0x102f   : > { %v2273_v24 = vmul.f32 %v2271_v22, %v2265_v20 }
0x1030   : > { %v2272_v25 = vmul.f32 %v2270_v23, %v2260_v21 }
0x1031   : > { %v2275_v26 = vmul.f32 %v2273_v24, %v2265_v20 }
0x1032   : > { %v2274_v27 = vmul.f32 %v2272_v25, %v2260_v21 }
0x1033   : > { %v2277_v12 = vadd.f32 %v2275_v26, %v2265_v20 }
0x1034   : > { %v2276_v28 = vadd.f32 %v2274_v27, %v2260_v21 }
0x1035   : > { %v2279_v29 = vmul.f32 0.7978846, %v2277_v12 }
0x1036   : > { %v2278_v30 = vmul.f32 0.7978846, %v2276_v28 }
0x1037   : > { %4963 = vtanh.f32 %v2279_v29 }
0x1038   : > { %4965 = vtanh.f32 %v2278_v30 }
0x1041   : > { %v4964_v31 = vpop.eup %4963 }
0x1042   : > { %v4966_v32 = vpop.eup %4965  ;;  %v2283_v33 = vadd.f32 1.0, %v4964_v31 }
0x1043   : > { %v2282_v35 = vadd.f32 1.0, %v4966_v32 }
0x1044   : > { %v2285_v42 = vmul.f32 %v2283_v33, %v2269_v36 }
0x1045   : > { %v2284_v41 = vmul.f32 %v2282_v35, %v2268_v34 }
0x1047   : > { %4454 = vmatprep.mubr.msk.f32.mxu1 %vm766_vm1, %v2284_v41 }
0x1048   : > { %4455 = vmatmul.mubr.msk.f32.vlgmr.msra.gmra.mrb[10].mxu1 %vm766_vm1, %v2285_v42 }
0x111b   : > { %v4456_v44 = vpop.f32.mrb[10].mxu1 }
0x111c   : > { %v2369_v45 = vpop.f32.mrb[11].mxu1  ;;  %v2375_v46 = vadd.f32 %v4456_v44, %v4133_v43 }
0x111d   : > { %v2370_v40 = vadd.f32 %v4133_v43, %v2369_v45 }
0x111e   : > { %v5830_v47 = vadd.f32 %v2375_v46, %v5798_v37 }
0x111f   : > { %v5827_v39 = vadd.f32 %v2370_v40, %v5800_v38 }
0x1120   : > { %v2387_v49 = vsel %vm766_vm1, %v5830_v47, 0.0 }
0x1121   : > { %v2384_v48 = vsel %vm766_vm1, %v5827_v39, 0.0 }
0x1122   : > { %2385 = vadd.xlane.f32.xlu0 %v2384_v48 }
0x1126   : > { %2388 = vadd.xlane.f32.xlu0 %v2387_v49 }
0x11af   : > { %v2386_v50 = vpop.xlane.xlu0 %2385 }
0x11b0   : > { %v2390_v51 = vmul.f32 0.03125, %v2386_v50 }
0x11b2   : > { %v2392_v52 = vsub.f32 %v5827_v39, %v2390_v51 }
0x11b3   : > { %v2389_v54 = vpop.xlane.xlu0 %2388 }
0x11b4   : > { %v2391_v53 = vmul.f32 0.03125, %v2389_v54  ;;  %v2394_v55 = vmul.f32 %v2392_v52, %v2392_v52 }
0x11b6   : > { %v2393_v38 = vsub.f32 %v5830_v47, %v2391_v53  ;;  %v2396_v37 = vsel %vm766_vm1, %v2394_v55, 0.0 }
0x11b7   : > { %2397 = vadd.xlane.f32.xlu0 %v2396_v37 }
0x11b8   : > { %v2395_v56 = vmul.f32 %v2393_v38, %v2393_v38 }
0x11ba   : > { %v2399_v57 = vsel %vm766_vm1, %v2395_v56, 0.0 }
0x11bb   : > { %2400 = vadd.xlane.f32.xlu1 %v2399_v57 }
0x1244   : > { %v2398_v0 = vpop.xlane.xlu0 %2397 }
0x1245   : > { %v2402_v1 = vmul.f32 0.03125, %v2398_v0 }
0x1247   : > { %v2404_v2 = vadd.f32 1e-05, %v2402_v1 }
0x1248   : > { %v2401_v3 = vpop.xlane.xlu1 %2400 }
0x1249   : > { %4967 = vrsqrt.f32 %v2404_v2  ;;  %v2403_v4 = vmul.f32 0.03125, %v2401_v3 }
0x124b   : > { %v2405_v5 = vadd.f32 1e-05, %v2403_v4 }
0x124d   : > { %4969 = vrsqrt.f32 %v2405_v5 }
0x1253   : > { %v4968_v6 = vpop.eup %4967 }
0x1254   : > { %v2408_v8 = vmul.f32 %v4968_v6, %v2392_v52 }
0x1256   : > { %v2416_v10 = vmul.f32 %v4138_v7, %v2408_v8 }
0x1257   : > { %v4970_v11 = vpop.eup %4969 }
0x1258   : > { %v2409_v14 = vmul.f32 %v4970_v11, %v2393_v38  ;;  %v2424_v15 = vadd.f32 %v4139_v9, %v2416_v10 }
0x125a   : > { %v2417_v16 = vmul.f32 %v4138_v7, %v2409_v14  ;;  %4465 = vmatprep.mubr.msk.f32.mxu0 %vm766_vm1, %v2424_v15 }
0x125c   : > { %v2425_v18 = vadd.f32 %v4139_v9, %v2417_v16 }
0x125e   : > { %4466 = vmatmul.mubr.msk.f32.vlgmr.msra.gmra.mrb[16].mxu0 %vm766_vm1, %v2425_v18 }
0x1331   : > { %v5860_v19 = vpop.f32.mrb[16].mxu0 }
0x1332   : > { %v5862_v20 = vpop.f32.mrb[17].mxu0 }
0x1333   : > { %4472 = vmatprep.mubr.msk.f32.mxu1 %vm655_vm0, %v5862_v20  ;;  %v5868_v13 = vpack.i.bf16 %v5860_v19, %v5862_v20 }
0x1335   : > { %4880 = vrot.lane.b32.xlu0 %v5868_v13, %s5296_s27  ;;  %s6122_s27 = smov 56  }
0x1339   : > { %4890 = vrot.lane.b32.xlu0 %v5868_v13, %s5297_s0  ;;  %s6123_s0 = smov 48  }
0x133d   : > { %2717 = vrot.lane.b32.xlu0 %v5862_v20, %s5298_s30 }
0x1341   : > { %2719 = vrot.lane.b32.xlu0 %v5860_v19, %s5298_s30  ;;  %s6124_s30 = smov 40  }
0x1345   : > { %3081 = vrot.lane.b32.xlu0 %v5862_v20, %s5301_s22 }
0x13a7   : > { %v4881_v21 = vpop.permute.xlu0 %4880 }
0x13a8   : > { %v4883_v22 = vunpack.i.h.bf16 %v4881_v21  ;;  %v4882_v23 = vunpack.i.l.bf16 %v4881_v21 }
0x13aa   : > { %v4646_v24 = vpack.c.bf16 %v4883_v22, %v4882_v23 }
0x13ab   : > { %v4891_v46 = vpop.permute.xlu0 %4890 }
0x13ac   : > { %4648 = vmatprep.subr.msk.bf16.mxu1 %vm5707_vm2, %v4646_v24  ;;  %v4893_v48 = vunpack.i.h.bf16 %v4891_v46  ;;  %v4892_v49 = vunpack.i.l.bf16 %v4891_v46 }
0x13ad   : > { %4651 = vmatpush3.bf16.xpose.msk.msra.mxu1 %vm5707_vm2, %v4646_v24 }
0x13ae   : > { %v4656_v54 = vpack.c.bf16 %v4893_v48, %v4892_v49 }
0x13af   : > { %v2718_v57 = vpop.permute.xlu0 %2717 }
0x13b3   : > { %v2720_v61 = vpop.permute.xlu0 %2719 }
0x13b4   : > { %4473 = vmatmul.mubr.msk.f32.vlgmr.msra.gmra.mrb[12].mxu1 %vm655_vm0, %v5860_v19 }
0x13b7   : > { %v3082_v62 = vpop.permute.xlu0 %3081 }
0x1487   : > { %v4474_v25 = vpop.f32.mrb[12].mxu1 }
0x1488   : > { %v2597_v26 = vpop.f32.mrb[13].mxu1  ;;  %v2607_v12 = vmul.f32 0.35355338, %v4474_v25 }
0x1489   : > { %v2606_v27 = vmul.f32 0.35355338, %v2597_v26 }
0x148a   : > { %v2611_v29 = vsel %vm1077_vm3, %v2607_v12, -inf }
0x148b   : > { %v2608_v28 = vsel %vm1077_vm3, %v2606_v27, -inf }
0x148c   : > { %2609 = vmax.xlane.f32.xlu1 %v2608_v28 }
0x1490   : > { %2612 = vmax.xlane.f32.xlu1 %v2611_v29 }
0x1519   : > { %v2610_v30 = vpop.xlane.xlu1 %2609 }
0x151a   : > { %v2614_v31 = vsub.f32 %v2606_v27, %v2610_v30 }
0x151c   : > { %v2616_v34 = vmul.f32 1.442695, %v2614_v31 }
0x151d   : > { %v2613_v32 = vpop.xlane.xlu1 %2612 }
0x151e   : > { %v2615_v33 = vsub.f32 %v2607_v12, %v2613_v32 }
0x1520   : > { %v2618_v35 = vmul.f32 1.442695, %v2615_v33 }
0x1522   : > { %4971 = vpow2.f32 %v2618_v35 }
0x1523   : > { %4973 = vpow2.f32 %v2616_v34 }
0x152c   : > { %v4972_v36 = vpop.eup %4971 }
0x152d   : > { %v2623_v41 = vsel %vm1077_vm3, %v4972_v36, 0.0  ;;  %v4974_v42 = vpop.eup %4973 }
0x152e   : > { %2624 = vadd.xlane.f32.xlu1 %v2623_v41  ;;  %v2620_v43 = vsel %vm1077_vm3, %v4974_v42, 0.0 }
0x1532   : > { %2621 = vadd.xlane.f32.xlu1 %v2620_v43 }
0x1543   : > { %4885 = vrot.lane.b32.xlu1 %v5868_v13, %s5299_s16 }
0x1547   : > { %4895 = vrot.lane.b32.xlu1 %v5868_v13, %s5304_s23 }
0x154b   : > { %3083 = vrot.lane.b32.xlu1 %v5860_v19, %s5301_s22 }
0x15bb   : > { %v2625_v44 = vpop.xlane.xlu1 %2624 }
0x15bc   : > { %4975 = vrcp.f32 %v2625_v44 }
0x15bf   : > { %v2622_v45 = vpop.xlane.xlu1 %2621 }
0x15c0   : > { %4977 = vrcp.f32 %v2622_v45 }
0x15c3   : > { %v4886_v40 = vpop.permute.xlu1 %4885 }
0x15c4   : > { %v4888_v50 = vunpack.i.h.bf16 %v4886_v40  ;;  %v4887_v51 = vunpack.i.l.bf16 %v4886_v40 }
0x15c6   : > { %v4652_v52 = vpack.c.bf16 %v4888_v50, %v4887_v51  ;;  %v4976_v53 = vpop.eup %4975 }
0x15c7   : > { %v4896_v38 = vpop.permute.xlu1 %4895  ;;  %v2629_v56 = vmul.f32 %v4976_v53, %v4972_v36 }
0x15c8   : > { %4653 = vmatprep.subr.bf16.mxu0 %v4652_v52  ;;  %v4898_v58 = vunpack.i.h.bf16 %v4896_v38  ;;  %v4897_v59 = vunpack.i.l.bf16 %v4896_v38 }
0x15c9   : > { %4655 = vmatpush3.bf16.msra.mxu0 %v4652_v52 }
0x15ca   : > { %v4978_v55 = vpop.eup %4977  ;;  %4658 = vmatprep.subr.msk.bf16.mxu0 %vm5707_vm2, %v4656_v54  ;;  %v4666_v60 = vpack.c.bf16 %v4898_v58, %v4897_v59  ;;  %v2514_v59 = vld [vmem:[#allocation10 + $0x28] sm:$0xff] }
0x15cb   : > { %v2627_v37 = vmul.f32 %v4978_v55, %v4974_v42  ;;  %v3084_v63 = vpop.permute.xlu1 %3083 }
0x15cd   : > { %4479 = vmatprep.mubr.msk.f32.mxu0 %vm1077_vm3, %v2627_v37 }
0x15ce   : > { %4480 = vmatmul.mubr.msk.f32.vlgmr.msra.gmra.mrb[18].mxu0 %vm1077_vm3, %v2629_v56 }
0x15cf   : > { %4486 = vmatprep.mubr.msk.f32.mxu0 %vm655_vm0, %v2718_v57 }
0x15d2   : > { %4661 = vmatpush3.bf16.xpose.msk.msra.mxu0 %vm5707_vm2, %v4656_v54 }
0x15d3   : > { %4668 = vmatprep.subr.msk.bf16.mxu0 %vm5707_vm2, %v4666_v60 }
0x15d9   : > { %4487 = vmatmul.mubr.msk.f32.vlgmr.msra.gmra.mrb[20].mxu0 %vm655_vm0, %v2720_v61 }
0x15da   : > { %4671 = vmatpush3.bf16.xpose.msk.msra.mxu0 %vm5707_vm2, %v4666_v60  ;;  %4510 = vmatprep.mubr.msk.f32.mxu0 %vm655_vm0, %v3082_v62  ;;  %v2513_v60 = vld [vmem:[#allocation10 + $0x20] sm:$0xff] }
0x15e1   : > { %4511 = vmatmul.mubr.msk.f32.vlgmr.msra.gmra.mrb[22].mxu0 %vm655_vm0, %v3084_v63 }
0x16a1   : > { %v5910_v0 = vpop.f32.mrb[18].mxu0 }
0x16a2   : > { %v5912_v1 = vpop.f32.mrb[19].mxu0 }
0x16ac   : > { %v4488_v2 = vpop.f32.mrb[20].mxu0 }
0x16ad   : > { %v2809_v3 = vmul.f32 0.35355338, %v4488_v2  ;;  %v2799_v4 = vpop.f32.mrb[21].mxu0 }
0x16ae   : > { %v2808_v5 = vmul.f32 0.35355338, %v2799_v4 }
0x16af   : > { %v2813_v6 = vsel %vm1077_vm3, %v2809_v3, -inf }
0x16b0   : > { %2814 = vmax.xlane.f32.xlu1 %v2813_v6  ;;  %v2810_v7 = vsel %vm1077_vm3, %v2808_v5, -inf }
0x16b1   : > { %2811 = vmax.xlane.f32.xlu0 %v2810_v7 }
0x16b4   : > { %v4512_v8 = vpop.f32.mrb[22].mxu0 }
0x16b5   : > { %v3163_v9 = vpop.f32.mrb[23].mxu0  ;;  %v3173_v10 = vmul.f32 0.35355338, %v4512_v8 }
0x16b6   : > { %v3172_v17 = vmul.f32 0.35355338, %v3163_v9 }
0x16b7   : > { %v3177_v11 = vsel %vm1077_vm3, %v3173_v10, -inf }
0x16b8   : > { %v3174_v33 = vsel %vm1077_vm3, %v3172_v17, -inf }
0x16c1   : > { %4905 = vrot.lane.b32.xlu1 %v5868_v13, %s5302_s19 }
0x16c5   : > { %3366 = vrot.lane.b32.xlu1 %v5862_v20, %s5303_s24 }
0x16c9   : > { %3368 = vrot.lane.b32.xlu1 %v5860_v19, %s5303_s24  ;;  %s6127_s24 = sld [smem:[#allocation33_spill]] }
0x16cf   : > { %s6128_s23 = smov %s6127_s24 }
0x16ed   : > { %3178 = vmax.xlane.f32.xlu1 %v3177_v11 }
0x173d   : > { %v2815_v14 = vpop.xlane.xlu1 %2814 }
0x173e   : > { %v2817_v15 = vsub.f32 %v2809_v3, %v2815_v14  ;;  %v2812_v16 = vpop.xlane.xlu0 %2811 }
0x173f   : > { %v2816_v18 = vsub.f32 %v2808_v5, %v2812_v16 }
0x1740   : > { %v2820_v21 = vmul.f32 1.442695, %v2817_v15 }
0x1741   : > { %v2818_v22 = vmul.f32 1.442695, %v2816_v18  ;;  %v4906_v23 = vpop.permute.xlu1 %4905 }
0x1742   : > { %4979 = vpow2.f32 %v2820_v21  ;;  %v4908_v24 = vunpack.i.h.bf16 %v4906_v23  ;;  %v4907_v25 = vunpack.i.l.bf16 %v4906_v23 }
0x1743   : > { %4981 = vpow2.f32 %v2818_v22 }
0x1744   : > { %v4676_v26 = vpack.c.bf16 %v4908_v24, %v4907_v25  ;;  %v2515_v25 = vld [vmem:[#allocation10 + $0x30] sm:$0xff] }
0x1745   : > { %v3367_v20 = vpop.permute.xlu1 %3366 }
0x1746   : > { %4678 = vmatprep.subr.msk.bf16.mxu0 %vm5707_vm2, %v4676_v26  ;;  %4529 = vmatprep.mubr.msk.f32.mxu0 %vm655_vm0, %v3367_v20 }
0x1747   : > { %4681 = vmatpush3.bf16.xpose.msk.msra.mxu0 %vm5707_vm2, %v4676_v26 }
0x1749   : > { %v3369_v27 = vpop.permute.xlu1 %3368 }
0x174c   : > { %v4980_v19 = vpop.eup %4979 }
0x174d   : > { %v2825_v12 = vsel %vm1077_vm3, %v4980_v19, 0.0  ;;  %v4982_v28 = vpop.eup %4981 }
0x174e   : > { %4530 = vmatmul.mubr.msk.f32.vlgmr.msra.gmra.mrb[24].mxu0 %vm655_vm0, %v3369_v27  ;;  %2826 = vadd.xlane.f32.xlu0 %v2825_v12  ;;  %v2822_v29 = vsel %vm1077_vm3, %v4982_v28, 0.0 }
0x1752   : > { %2823 = vadd.xlane.f32.xlu0 %v2822_v29 }
0x1768   : > { %4900 = vrot.lane.b32.xlu0 %v5868_v13, %s6122_s27  ;;  %s6126_s27 = sld [smem:[#allocation26_spill]] }
0x176e   : > { %p6129_p1 = scmp.ne.s32.totalorder %s6126_s27, 0 }
0x177a   : > { %v3179_v30 = vpop.xlane.xlu1 %3178 }
0x177b   : > { %v3181_v31 = vsub.f32 %v3173_v10, %v3179_v30 }
0x177d   : > { %v3184_v32 = vmul.f32 1.442695, %v3181_v31 }
0x177f   : > { %4983 = vpow2.f32 %v3184_v32 }
0x1787   : > { %3175 = vmax.xlane.f32.xlu0 %v3174_v33 }
0x1789   : > { %v5934_v34 = vpop.eup %4983 }
0x178a   : > { %v3189_v35 = vsel %vm1077_vm3, %v5934_v34, 0.0 }
0x178b   : > { %3190 = vadd.xlane.f32.xlu0 %v3189_v35 }
0x17db   : > { %v2827_v36 = vpop.xlane.xlu0 %2826 }
0x17dc   : > { %4985 = vrcp.f32 %v2827_v36  ;;  %v4179_v36 = vld [vmem:[%s6061_s10 + $0x1] ss:$0 sm:$0xff] }
0x17df   : > { %v2824_v41 = vpop.xlane.xlu0 %2823 }
0x17e0   : > { %4987 = vrcp.f32 %v2824_v41 }
0x17e3   : > { %v4901_v42 = vpop.permute.xlu0 %4900 }
0x17e4   : > { %v4903_v43 = vunpack.i.h.bf16 %v4901_v42  ;;  %v4902_v44 = vunpack.i.l.bf16 %v4901_v42 }
0x17e6   : > { %v4662_v45 = vpack.c.bf16 %v4903_v43, %v4902_v44  ;;  %v4986_v46 = vpop.eup %4985 }
0x17e7   : > { %v2831_v49 = vmul.f32 %v4986_v46, %v4980_v19 }
0x17e8   : > { %4663 = vmatprep.subr.bf16.mxu1 %v4662_v45 }
0x17e9   : > { %4665 = vmatpush3.bf16.msra.mxu1 %v4662_v45 }
0x17ea   : > { %v4988_v40 = vpop.eup %4987  ;;  %4496 = vmatprep.subr.mxu1 %v2514_v59 }
0x17eb   : > { %v2829_v48 = vmul.f32 %v4988_v40, %v4982_v28 }
0x17ed   : > { %4493 = vmatprep.mubr.msk.f32.mxu1 %vm1077_vm3, %v2829_v48 }
0x17ee   : > { %4494 = vmatmul.mubr.msk.f32.vlgmr.msra.gmra.mrb[14].mxu1 %vm1077_vm3, %v2831_v49 }
0x17ef   : > { %4497 = vmatpush3.msra.mxu1 %v2514_v59 }
0x17f0   : > { %4501 = vmatprep.subr.mxu1 %v2513_v60 }
0x1814   : > { %v3176_v50 = vpop.xlane.xlu0 %3175 }
0x1815   : > { %v3180_v51 = vsub.f32 %v3172_v17, %v3176_v50 }
0x1817   : > { %v3182_v52 = vmul.f32 1.442695, %v3180_v51 }
0x1818   : > { %v3191_v61 = vpop.xlane.xlu0 %3190 }
0x1819   : > { %4989 = vpow2.f32 %v3182_v52 }
0x1821   : > { %v4531_v54 = vpop.f32.mrb[24].mxu0 }
0x1822   : > { %v3448_v53 = vpop.f32.mrb[25].mxu0  ;;  %v3458_v56 = vmul.f32 0.35355338, %v4531_v54 }
0x1823   : > { %v4990_v55 = vpop.eup %4989  ;;  %v3457_v38 = vmul.f32 0.35355338, %v3448_v53 }
0x1824   : > { %v3186_v37 = vsel %vm1077_vm3, %v4990_v55, 0.0  ;;  %v3462_v58 = vsel %vm1077_vm3, %v3458_v56, -inf }
0x1825   : > { %3187 = vadd.xlane.f32.xlu0 %v3186_v37  ;;  %v3459_v57 = vsel %vm1077_vm3, %v3457_v38, -inf  ;;  %v3711_v37 = vld [vmem:[#allocation11 + $0x28] sm:$0xff] }
0x1826   : > { %3460 = vmax.xlane.f32.xlu1 %v3459_v57  ;;  %v3712_v57 = vld [vmem:[#allocation11 + $0x30] sm:$0xff] }
0x182a   : > { %3463 = vmax.xlane.f32.xlu1 %v3462_v58  ;;  %v3713_v58 = vld [vmem:[#allocation11 + $0x38] sm:$0xff] }
0x182b   : > { %v4690_v59 = vpack.c.bf16 %v3713_v58, %v3712_v57 }
0x183b   : > { %4910 = vrot.lane.b32.xlu0 %v5868_v13, %s6123_s0  ;;  %s4198_s0 = sshll.u32 %s5421_s28, 8  ;;  %s6010_s28 = scalar_lea.sflag [#allocation4], %s637_s21 }
0x183c   : > { %s6003_s18 = scalar_lea.hbm %s6127_s24, %s4198_s0 }
0x18b2   : > { %v3188_v2 = vpop.xlane.xlu0 %3187 }
0x18b3   : > { %v3461_v62 = vpop.xlane.xlu1 %3460 }
0x18b4   : > { %v3465_v63 = vsub.f32 %v3457_v38, %v3461_v62  ;;  %v3710_v38 = vld [vmem:[#allocation11 + $0x20] sm:$0xff] }
0x18b6   : > { %v3467_v5 = vmul.f32 1.442695, %v3465_v63  ;;  %v4911_v7 = vpop.permute.xlu0 %4910 }
0x18b7   : > { %v3464_v3 = vpop.xlane.xlu1 %3463  ;;  %v4913_v8 = vunpack.i.h.bf16 %v4911_v7  ;;  %v4912_v9 = vunpack.i.l.bf16 %v4911_v7  ;;  %v4183_v7 = vld [vmem:[%s6063_s12 + $0x1] ss:$0 sm:$0xff] }
0x18b8   : > { %v3466_v4 = vsub.f32 %v3458_v56, %v3464_v3  ;;  %v4686_v56 = vpack.c.bf16 %v3711_v37, %v3710_v38 }
0x18b9   : > { %v4672_v14 = vpack.c.bf16 %v4913_v8, %v4912_v9 }
0x18ba   : > { %v3469_v6 = vmul.f32 1.442695, %v3466_v4  ;;  %4687 = vmatprep.subr.bf16.mxu0 %v4686_v56 }
0x18bb   : > { %4689 = vmatpush3.bf16.msra.mxu0 %v4686_v56 }
0x18bc   : > { %4991 = vpow2.f32 %v3469_v6  ;;  %4691 = vmatprep.subr.bf16.mxu0 %v4690_v59 }
0x18bd   : > { %4993 = vrcp.f32 %v3188_v2 }
0x18be   : > { %4995 = vpow2.f32 %v3467_v5  ;;  %v4182_v5 = vld [vmem:[%s6062_s11 + $0x1] ss:$0 sm:$0xff] }
0x18bf   : > { %4997 = vrcp.f32 %v3191_v61  ;;  %4693 = vmatpush3.bf16.msra.mxu0 %v4690_v59 }
0x18c1   : > { %v4495_v10 = vpop.f32.mrb[14].mxu1 }
0x18c2   : > { %v2910_v11 = vpop.f32.mrb[15].mxu1 }
0x18c3   : > { %4498 = vmatprep.mubr.msk.f32.mxu1 %vm655_vm0, %v2910_v11 }
0x18c4   : > { %4499 = vmatmul.mubr.msk.f32.vlgmr.msra.gmra.mrb[16].mxu1 %vm655_vm0, %v4495_v10 }
0x18c5   : > { %4502 = vmatpush3.msra.mxu1 %v2513_v60  ;;  %4503 = vmatprep.mubr.msk.f32.mxu1 %vm655_vm0, %v5912_v1 }
0x18c6   : > { %v4992_v15 = vpop.eup %4991  ;;  %4673 = vmatprep.subr.bf16.mxu1 %v4672_v14 }
0x18c7   : > { %v4994_v16 = vpop.eup %4993  ;;  %v3474_v18 = vsel %vm1077_vm3, %v4992_v15, 0.0 }
0x18c8   : > { %v4996_v21 = vpop.eup %4995  ;;  %3475 = vadd.xlane.f32.xlu1 %v3474_v18  ;;  %v3193_v24 = vmul.f32 %v4994_v16, %v4990_v55  ;;  %v3822_v16 = vld [vmem:[#allocation13 + $0x20] sm:$0xff]  ;;  %v3823_v18 = vld [vmem:[#allocation13 + $0x28] sm:$0xff] }
0x18c9   : > { %v4998_v22 = vpop.eup %4997  ;;  %v3471_v23 = vsel %vm1077_vm3, %v4996_v21, 0.0 }
0x18ca   : > { %v3195_v1 = vmul.f32 %v4998_v22, %v5934_v34  ;;  %v4694_v22 = vpack.c.bf16 %v3823_v18, %v3822_v16 }
0x18cc   : > { %3472 = vadd.xlane.f32.xlu1 %v3471_v23  ;;  %4504 = vmatmul.mubr.msk.f32.vlgmr.msra.gmra.mrb[16].mxu1 %vm655_vm0, %v5910_v0  ;;  %v3825_v23 = vld [vmem:[#allocation13 + $0x38] sm:$0xff] }
0x18cd   : > { %4675 = vmatpush3.bf16.msra.mxu1 %v4672_v14  ;;  %4517 = vmatprep.mubr.msk.f32.mxu1 %vm1077_vm3, %v3193_v24 }
0x18ce   : > { %4520 = vmatprep.subr.mxu1 %v2515_v25 }
0x18d0   : > { %4518 = vmatmul.mubr.msk.f32.vlgmr.msra.gmra.mrb[18].mxu1 %vm1077_vm3, %v3195_v1  ;;  %v4185_v1 = vld [vmem:[%s6120_s14 + $0x1] ss:$0 sm:$0xff] }
0x18d1   : > { %4521 = vmatpush3.msra.mxu1 %v2515_v25 }
0x18dd   : > { %4915 = vrot.lane.b32.xlu1 %v5868_v13, %s6124_s30  ;;  %v2516_v13 = vld [vmem:[#allocation10 + $0x38] sm:$0xff]  ;;  %s639_s30 = scalar_lea.vmem [#allocation14], %s4082_s29  ;;  %s5213_s29 = scalar_lea.vmem %s5212_s20, 512 }
0x18de   : > { %s3933_s16 = sshll.u32 %s639_s30, 4  ;;  %s6005_s16 = int_to_ptr.vmem [resolvable:$true] %s3933_s16 }
0x18df   : > { %s5207_s25 = scalar_lea.vmem %s6005_s16, 256  ;;  %p5214_p5 = scmp.lt.s32.totalorder %s6005_s16, %s5212_s20 }
0x18e0   : > { %p5208_p13 = scmp.ne.s32.totalorder %s6005_s16, %s5207_s25  ;;  %p5215_p0 = scmp.lt.s32.totalorder %s5213_s29, %s5207_s25 }
0x18e2   : > { %p5209_p6 = pnand %p5208_p13, %p6129_p1  ;;  %p5216_p10 = por %p5215_p0, %p5214_p5 }
0x18e4   : > { %p5210_p9 = pneg %p5209_p6 }
0x18e6   : > { %p5217_p2 = pnand %p5216_p10, %p5210_p9 }
0x1955   : > { %v3476_v26 = vpop.xlane.xlu1 %3475 }
0x1959   : > { %v3473_v20 = vpop.xlane.xlu1 %3472 }
0x195a   : > { %4999 = vrcp.f32 %v3473_v20 }
0x195b   : > { %5001 = vrcp.f32 %v3476_v26 }
0x195d   : > { %v4916_v19 = vpop.permute.xlu1 %4915 }
0x195e   : > { %v4918_v27 = vunpack.i.h.bf16 %v4916_v19  ;;  %v4917_v12 = vunpack.i.l.bf16 %v4916_v19 }
0x1960   : > { %v4682_v28 = vpack.c.bf16 %v4918_v27, %v4917_v12 }
0x1962   : > { %4683 = vmatprep.subr.bf16.mxu1 %v4682_v28 }
0x1964   : > { %v5000_v0 = vpop.eup %4999 }
0x1965   : > { %v5002_v31 = vpop.eup %5001  ;;  %v3478_v32 = vmul.f32 %v5000_v0, %v4996_v21  ;;  %v3824_v21 = vld [vmem:[#allocation13 + $0x30] sm:$0xff] }
0x1966   : > { %v3480_v17 = vmul.f32 %v5002_v31, %v4992_v15  ;;  %v4698_v24 = vpack.c.bf16 %v3825_v23, %v3824_v21 }
0x19a3   : > { %v4519_v29 = vpop.f32.mrb[18].mxu1 }
0x19a4   : > { %v3274_v30 = vpop.f32.mrb[19].mxu1 }
0x19a5   : > { %4522 = vmatprep.mubr.msk.f32.mxu1 %vm655_vm0, %v3274_v30 }
0x19a6   : > { %4523 = vmatmul.mubr.msk.f32.vlgmr.msra.gmra.mrb[16].mxu1 %vm655_vm0, %v4519_v29 }
0x19a7   : > { %4685 = vmatpush3.bf16.msra.mxu1 %v4682_v28  ;;  %4536 = vmatprep.mubr.msk.f32.mxu1 %vm1077_vm3, %v3478_v32 }
0x19a8   : > { %4539 = vmatprep.subr.mxu1 %v2516_v13 }
0x19aa   : > { %4537 = vmatmul.mubr.msk.f32.vlgmr.msra.gmra.mrb[20].mxu1 %vm1077_vm3, %v3480_v17 }
0x19ab   : > { %4540 = vmatpush3.msra.mxu1 %v2516_v13 }
0x19ac   : > { %4695 = vmatprep.subr.bf16.mxu1 %v4694_v22 }
0x1a7d   : > { %v4538_v33 = vpop.f32.mrb[20].mxu1 }
0x1a7e   : > { %v3559_v34 = vpop.f32.mrb[21].mxu1 }
0x1a7f   : > { %4541 = vmatprep.mubr.msk.f32.mxu1 %vm655_vm0, %v3559_v34 }
0x1a80   : > { %4542 = vmatmul.mubr.msk.f32.vlgmr.msra.gmra.mrb[16].mxu1 %vm655_vm0, %v4538_v33 }
0x1a81   : > { %4697 = vmatpush3.bf16.msra.mxu1 %v4694_v22 }
0x1a82   : > { %4699 = vmatprep.subr.bf16.mxu1 %v4698_v24 }
0x1a85   : > { %4701 = vmatpush3.bf16.msra.mxu1 %v4698_v24 }
0x1b53   : > { %v4543_v35 = vpop.f32.mrb[16].mxu1 }
0x1b54   : > { %v3652_v41 = vadd.f32 %v4543_v35, %v5830_v47  ;;  %v3640_v42 = vpop.f32.mrb[17].mxu1 }
0x1b55   : > { %v3651_v43 = vadd.f32 %v3640_v42, %v5827_v39 }
0x1b56   : > { %v5969_v44 = vadd.f32 %v4179_v36, %v3652_v41 }
0x1b57   : > { %v5971_v45 = vadd.f32 %v4179_v36, %v3651_v43 }
0x1b58   : > { %v3670_v46 = vsel %vm766_vm1, %v5969_v44, 0.0 }
0x1b59   : > { %3671 = vadd.xlane.f32.xlu1 %v3670_v46  ;;  %v3667_v40 = vsel %vm766_vm1, %v5971_v45, 0.0 }
0x1b5a   : > { %3668 = vadd.xlane.f32.xlu0 %v3667_v40  ;;  %v4189_v40 = vld [vmem:[%s6121_s17 + $0x1] ss:$0 sm:$0xff] }
0x1be6   : > { %v3672_v48 = vpop.xlane.xlu1 %3671 }
0x1be7   : > { %v3674_v49 = vmul.f32 0.03125, %v3672_v48  ;;  %v3669_v50 = vpop.xlane.xlu0 %3668 }
0x1be8   : > { %v3673_v51 = vmul.f32 0.03125, %v3669_v50 }
0x1be9   : > { %v3676_v47 = vsub.f32 %v5969_v44, %v3674_v49 }
0x1bea   : > { %v3675_v39 = vsub.f32 %v5971_v45, %v3673_v51 }
0x1beb   : > { %v3678_v53 = vmul.f32 %v3676_v47, %v3676_v47 }
0x1bec   : > { %v3677_v52 = vmul.f32 %v3675_v39, %v3675_v39 }
0x1bed   : > { %v3682_v55 = vsel %vm766_vm1, %v3678_v53, 0.0 }
0x1bee   : > { %v3679_v54 = vsel %vm766_vm1, %v3677_v52, 0.0 }
0x1bef   : > { %3680 = vadd.xlane.f32.xlu0 %v3679_v54 }
0x1bf3   : > { %3683 = vadd.xlane.f32.xlu0 %v3682_v55 }
0x1c7c   : > { %v3681_v60 = vpop.xlane.xlu0 %3680 }
0x1c7d   : > { %v3685_v61 = vmul.f32 0.03125, %v3681_v60 }
0x1c7f   : > { %v3687_v62 = vadd.f32 1e-05, %v3685_v61 }
0x1c80   : > { %v3684_v63 = vpop.xlane.xlu0 %3683 }
0x1c81   : > { %5003 = vrsqrt.f32 %v3687_v62  ;;  %v3686_v2 = vmul.f32 0.03125, %v3684_v63 }
0x1c83   : > { %v3688_v3 = vadd.f32 1e-05, %v3686_v2 }
0x1c85   : > { %5005 = vrsqrt.f32 %v3688_v3 }
0x1c8b   : > { %v5004_v4 = vpop.eup %5003 }
0x1c8c   : > { %v3691_v6 = vmul.f32 %v5004_v4, %v3675_v39 }
0x1c8e   : > { %v3699_v8 = vmul.f32 %v4182_v5, %v3691_v6 }
0x1c8f   : > { %v5006_v9 = vpop.eup %5005 }
0x1c90   : > { %v3692_v10 = vmul.f32 %v5006_v9, %v3676_v47  ;;  %v3707_v11 = vadd.f32 %v4183_v7, %v3699_v8 }
0x1c92   : > { %v3700_v14 = vmul.f32 %v4182_v5, %v3692_v10  ;;  %4552 = vmatprep.mubr.msk.f32.mxu0 %vm766_vm1, %v3707_v11 }
0x1c94   : > { %v3708_v15 = vadd.f32 %v4183_v7, %v3700_v14 }
0x1c96   : > { %4553 = vmatmul.mubr.msk.f32.vlgmr.msra.gmra.mrb[26].mxu0 %vm766_vm1, %v3708_v15 }
0x1d69   : > { %v4554_v25 = vpop.f32.mrb[26].mxu0 }
0x1d6a   : > { %v3800_v26 = vadd.f32 %v4554_v25, %v4185_v1  ;;  %v3794_v20 = vpop.f32.mrb[27].mxu0 }
0x1d6b   : > { %v3795_v19 = vadd.f32 %v4185_v1, %v3794_v20 }
0x1d6c   : > { %v3806_v27 = vmul.f32 0.044715, %v3800_v26  ;;  %v3804_v42 = vmul.f32 0.5, %v3800_v26 }
0x1d6d   : > { %v3805_v12 = vmul.f32 0.044715, %v3795_v19  ;;  %v3803_v36 = vmul.f32 0.5, %v3795_v19 }
0x1d6e   : > { %v3808_v28 = vmul.f32 %v3806_v27, %v3800_v26 }
0x1d6f   : > { %v3807_v0 = vmul.f32 %v3805_v12, %v3795_v19 }
0x1d70   : > { %v3810_v29 = vmul.f32 %v3808_v28, %v3800_v26 }
0x1d71   : > { %v3809_v30 = vmul.f32 %v3807_v0, %v3795_v19 }
0x1d72   : > { %v3812_v31 = vadd.f32 %v3810_v29, %v3800_v26 }
0x1d73   : > { %v3811_v32 = vadd.f32 %v3809_v30, %v3795_v19 }
0x1d74   : > { %v3814_v13 = vmul.f32 0.7978846, %v3812_v31 }
0x1d75   : > { %v3813_v17 = vmul.f32 0.7978846, %v3811_v32 }
0x1d76   : > { %5007 = vtanh.f32 %v3814_v13 }
0x1d77   : > { %5009 = vtanh.f32 %v3813_v17 }
0x1d80   : > { %v5008_v33 = vpop.eup %5007 }
0x1d81   : > { %v5010_v34 = vpop.eup %5009  ;;  %v3818_v35 = vadd.f32 1.0, %v5008_v33 }
0x1d82   : > { %v3817_v41 = vadd.f32 1.0, %v5010_v34 }
0x1d83   : > { %v3820_v46 = vmul.f32 %v3818_v35, %v3804_v42 }
0x1d84   : > { %v3819_v43 = vmul.f32 %v3817_v41, %v3803_v36 }
0x1d86   : > { %4563 = vmatprep.mubr.msk.f32.mxu1 %vm766_vm1, %v3819_v43 }
0x1d87   : > { %4564 = vmatmul.mubr.msk.f32.vlgmr.msra.gmra.mrb[22].mxu1 %vm766_vm1, %v3820_v46 }
0x1e5a   : > { %v4565_v48 = vpop.f32.mrb[22].mxu1 }
0x1e5b   : > { %v3912_v49 = vadd.f32 %v4565_v48, %v4189_v40  ;;  %v3906_v50 = vpop.f32.mrb[23].mxu1 }
0x1e5c   : > { %v3907_v51 = vadd.f32 %v4189_v40, %v3906_v50 }
0x1e5d   : > { %v3916_v47 = vadd.f32 %v3912_v49, %v5969_v44 }
0x1e5e   : > { %v3915_v39 = vadd.f32 %v3907_v51, %v5971_v45 }
0x1e5f   : > { %3918 = vst.msk [vmem:[%s639_s30 + $0x8] sm:$0xff] %vm766_vm1, %v3916_v47 }
0x1e60   : > { %3917 = vst.msk [vmem:[%s639_s30] sm:$0xff] %vm766_vm1, %v3915_v39 }
0x1e61   : > { %5220 = shalt.err (!%p5217_p2)
}
0x1e62   : > { %s5221_s21 = scalar_lea.hbm %s6003_s18, 256  ;;  %s5225_s0 = scalar_lea.hbm %s6128_s23, 512 }
0x1e63   : > { %p5222_p3 = scmp.ne.s32.totalorder %s6003_s18, %s5221_s21  ;;  %p5226_p7 = scmp.lt.u32.totalorder %s6003_s18, %s6128_s23 }
0x1e64   : > { %p5227_p8 = scmp.lt.u32.totalorder %s5225_s0, %s5221_s21  ;;  %p5229_p13 = scmp.lt.u32.totalorder %s5221_s21, %s6003_s18 }
0x1e65   : > { %p5223_p4 = pnand %p5222_p3, %p6129_p1 }
0x1e66   : > { %p5228_p11 = por %p5227_p8, %p5226_p7 }
0x1e67   : > { %p5224_p12 = pneg %p5223_p4 }
0x1e68   : > { %p5230_p6 = por %p5229_p13, %p5228_p11 }
0x1e6a   : > { %p5231_p9 = pnand %p5230_p6, %p5224_p12 }
0x1e6c   : > { %5234 = shalt.err (!%p5231_p9)
}
0x1e6d   : > { %s5308_s19 = smov 128   ;;  %s5309_s24 = smov 8  }
0x1e6e   : > { %4742 = dma.vmem_to_hbm [thread:$0]  (%p6129_p1), %s6005_s16, 256, %s6003_s18, %s6010_s28, %s5308_s19, %s5308_s19, %s5309_s24  }
0x1e6f PF: > { %s6130_s25 = sld [smem:[#allocation23_spill]]  ;;  %s6131_s3 = sld [smem:[#allocation20_spill]] }
0x1e70   : > { %s6132_s20 = sld [smem:[#allocation27_spill]] }
0x1e75   : > { %p4784_p5 = scmp.ge.s32.totalorder %s6130_s25, 2  ;;  %s3948_s29 = sand.u32 1, %s6131_s3  }
0x1e76   : > { %p6133_p0 = scmp.ne.s32.totalorder %s6132_s20, 0  ;;  %s3949_s21 = scalar_lea.sflag [#allocation4], %s3948_s29 }
0x1e78   : > { %p4767_p10 = pnand %p4784_p5, %p6133_p0 }
0x1e7a   : > { %5268 = dma.done.wait (!%p4767_p10), %s3949_s21, 256  }
0x1e7b   : > { %5270 = vsyncadd (!%p4767_p10), %s3949_s21, 4294967040  ;;  %s6134_s27 = sld [smem:[#allocation24_spill]]  ;;  %s6135_s24 = sld [smem:[#allocation21_spill]] }
0x1e7c   : > { %s6136_s25 = sld [smem:[#allocation22_spill]]  ;;  %s6137_s26 = sld [smem:[#allocation25_spill]] }
0x1e81   : > { %p31_p2 = scmp.ge.s32.totalorder %s6134_s27, 4  }
0x1e83   :  { %33 = sbr.rel (!%p31_p2) target bundleno = 14 (0xe), region = 163 }
0x1e8a   :  { %3954 = vsyncpa [#allocation3], 1 }
0x1e8b   :  { %3956 = vsyncpa [#allocation3 + $0x1], 1 }
0x1e8c   :  { %3957 = vsyncpa [#allocation6], 1 }
0x1e8d   :  { %3958 = vsyncpa [#allocation9], 1 }
0x1e8e   :  { %3959 = vsyncpa [#allocation12], 1 }
0x1e8f   :  { %3960 = vsyncpa [#allocation4], 1 }
0x1e90   :  { %3962 = vsyncpa [#allocation4 + $0x1], 1 }

</bundles_post_ra>
